<compile_context>
chip_gen: v5e
topology: v5e:2x2
jax: 0.10.0
libtpu: 0.0.40
codegen_flags: <defaults>
</compile_context>

<pallas_src>
import functools
import math

import jax
import jax.numpy as jnp
from jax import lax
from jax.experimental import pallas as pl
from jax.experimental.pallas import tpu as pltpu


# ----------------------------- small helpers -----------------------------

def _round_up(x, m):
    return (x + m - 1) // m * m


def _pick_tile(dim, candidates, fallback=None):
    """Largest candidate that evenly divides dim; else a bounded fallback (pad)."""
    for c in candidates:
        if dim >= c and dim % c == 0:
            return c
    return fallback if fallback is not None else min(candidates)


@functools.lru_cache(maxsize=None)
def _vmem_limit():
    """Per-generation scoped VMEM budget (~3/4 of physical, conservative fallback)."""
    try:
        cap = pltpu.get_tpu_info().vmem_capacity_bytes
        return min(int(cap * 3 // 4), 100 * 1024 * 1024)
    except Exception:
        return 48 * 1024 * 1024


# ----------------------------- tiled linear (K-tiled) -----------------------------

def _linear_kernel(x_ref, w_ref, b_ref, o_ref, acc_ref, *, activation):
    @pl.when(pl.program_id(2) == 0)
    def _():
        acc_ref[...] = jnp.zeros_like(acc_ref)

    acc_ref[...] += jnp.dot(x_ref[...], w_ref[...],
                            preferred_element_type=jnp.float32)

    @pl.when(pl.program_id(2) == pl.num_programs(2) - 1)
    def _():
        y = acc_ref[...] + b_ref[...]
        if activation == "relu":
            y = jnp.maximum(y, 0.0)
        elif activation == "tanh":
            y = jnp.tanh(y)
        o_ref[...] = y.astype(o_ref.dtype)


def linear(x, w, b, activation="none", out_dtype=None):
    """y = act(x @ w + b). x: (M, K) bf16, w: (K, N) bf16, b: (N,) f32 -> (M, N)."""
    M, K = x.shape
    N = w.shape[1]
    out_dtype = out_dtype or x.dtype

    tm = _pick_tile(M, (512, 256, 128, 64, 32, 16, 8), fallback=8)
    tn = _pick_tile(N, (512, 256, 128), fallback=256)
    tk = _pick_tile(K, (512, 256, 128), fallback=256)
    Mp, Np, Kp = _round_up(M, tm), _round_up(N, tn), _round_up(K, tk)

    x = x.astype(jnp.bfloat16)
    w = w.astype(jnp.bfloat16)
    b = b.astype(jnp.float32)
    if (Mp, Kp) != (M, K):
        x = jnp.pad(x, ((0, Mp - M), (0, Kp - K)))
    if (Kp, Np) != (K, N):
        w = jnp.pad(w, ((0, Kp - K), (0, Np - N)))
    if Np != N:
        b = jnp.pad(b, (0, Np - N))

    cost = pl.CostEstimate(
        flops=2 * Mp * Np * Kp,
        transcendentals=Mp * Np if activation == "tanh" else 0,
        bytes_accessed=2 * (Mp * Kp + Kp * Np + Mp * Np) + 4 * Np)

    out = pl.pallas_call(
        functools.partial(_linear_kernel, activation=activation),
        out_shape=jax.ShapeDtypeStruct((Mp, Np), out_dtype),
        grid=(Mp // tm, Np // tn, Kp // tk),
        in_specs=[
            pl.BlockSpec((tm, tk), lambda i, j, k: (i, k)),
            pl.BlockSpec((tk, tn), lambda i, j, k: (k, j)),
            pl.BlockSpec((1, tn), lambda i, j, k: (0, j)),
        ],
        out_specs=pl.BlockSpec((tm, tn), lambda i, j, k: (i, j)),
        scratch_shapes=[pltpu.VMEM((tm, tn), jnp.float32)],
        compiler_params=pltpu.CompilerParams(
            dimension_semantics=("parallel", "parallel", "arbitrary"),
            vmem_limit_bytes=_vmem_limit()),
        cost_estimate=cost,
    )(x, w, b.reshape(1, Np))

    if (Mp, Np) != (M, N):
        out = out[:M, :N]
    return out


# ------------------- fused matmul (+residual) + LayerNorm (K-tiled) -------------------

def _linear_norm_kernel(*refs, activation, has_residual, eps):
    if has_residual:
        x_ref, w_ref, b_ref, res_ref, g_ref, bn_ref, o_ref, acc_ref = refs
    else:
        x_ref, w_ref, b_ref, g_ref, bn_ref, o_ref, acc_ref = refs
        res_ref = None

    @pl.when(pl.program_id(1) == 0)
    def _():
        acc_ref[...] = jnp.zeros_like(acc_ref)

    acc_ref[...] += jnp.dot(x_ref[...], w_ref[...],
                            preferred_element_type=jnp.float32)

    @pl.when(pl.program_id(1) == pl.num_programs(1) - 1)
    def _():
        y = acc_ref[...] + b_ref[...]
        if activation == "relu":
            y = jnp.maximum(y, 0.0)
        if res_ref is not None:
            y = y + res_ref[...].astype(jnp.float32)
        mean = jnp.mean(y, axis=-1, keepdims=True)
        var = jnp.mean(jnp.square(y - mean), axis=-1, keepdims=True)
        y = (y - mean) * lax.rsqrt(var + eps)
        o_ref[...] = (y * g_ref[...] + bn_ref[...]).astype(o_ref.dtype)


def linear_layernorm(x, w, b, gamma, beta, residual=None, activation="none",
                     eps=1e-5, out_dtype=None):
    """LayerNorm(act(x @ w + b) [+ residual]) over the last dim (full N per row tile)."""
    M, K = x.shape
    N = w.shape[1]
    assert N % 128 == 0, "LayerNorm width must be a multiple of 128 lanes"
    out_dtype = out_dtype or x.dtype

    tm = _pick_tile(M, (256, 128, 64, 32, 16, 8), fallback=8)
    tk = _pick_tile(K, (512, 256, 128), fallback=256)
    Mp, Kp = _round_up(M, tm), _round_up(K, tk)

    x = x.astype(jnp.bfloat16)
    w = w.astype(jnp.bfloat16)
    if (Mp, Kp) != (M, K):
        x = jnp.pad(x, ((0, Mp - M), (0, Kp - K)))
    if Kp != K:
        w = jnp.pad(w, ((0, Kp - K), (0, 0)))

    has_res = residual is not None
    operands = [x, w, b.astype(jnp.float32).reshape(1, N)]
    in_specs = [
        pl.BlockSpec((tm, tk), lambda i, k: (i, k)),
        pl.BlockSpec((tk, N), lambda i, k: (k, 0)),
        pl.BlockSpec((1, N), lambda i, k: (0, 0)),
    ]
    if has_res:
        r = residual.astype(jnp.bfloat16)
        if Mp != M:
            r = jnp.pad(r, ((0, Mp - M), (0, 0)))
        operands.append(r)
        in_specs.append(pl.BlockSpec((tm, N), lambda i, k: (i, 0)))
    operands += [gamma.astype(jnp.float32).reshape(1, N),
                 beta.astype(jnp.float32).reshape(1, N)]
    in_specs += [pl.BlockSpec((1, N), lambda i, k: (0, 0)),
                 pl.BlockSpec((1, N), lambda i, k: (0, 0))]

    cost = pl.CostEstimate(
        flops=2 * Mp * N * Kp,
        transcendentals=0,
        bytes_accessed=2 * (Mp * Kp + Kp * N + (2 if has_res else 1) * Mp * N) + 12 * N)

    out = pl.pallas_call(
        functools.partial(_linear_norm_kernel, activation=activation,
                          has_residual=has_res, eps=eps),
        out_shape=jax.ShapeDtypeStruct((Mp, N), out_dtype),
        grid=(Mp // tm, Kp // tk),
        in_specs=in_specs,
        out_specs=pl.BlockSpec((tm, N), lambda i, k: (i, 0)),
        scratch_shapes=[pltpu.VMEM((tm, N), jnp.float32)],
        compiler_params=pltpu.CompilerParams(
            dimension_semantics=("parallel", "arbitrary"),
            vmem_limit_bytes=_vmem_limit()),
        cost_estimate=cost,
    )(*operands)

    if Mp != M:
        out = out[:M]
    return out


# ------------- fused QKV proj + attention + output projection + AddNorm1 -------------

def _attn_block_kernel(vl_ref, x_ref, wqkv_ref, bqkv_ref, wo_ref, bo_ref,
                       g_ref, bn_ref, o_ref, qkv_scr, ctx_scr,
                       *, scale, eps, num_heads, head_dim):
    b = pl.program_id(0)
    vl = vl_ref[b]
    hidden = num_heads * head_dim

    x = x_ref[0]                                                      # (S, H) bf16
    S = x.shape[0]

    # fused Q|K|V projection in VMEM (K = H, N = 3H -> full MXU depth)
    qkv_scr[...] = (jnp.dot(x, wqkv_ref[...], preferred_element_type=jnp.float32)
                    + bqkv_ref[...])                                  # (S, 3H) f32

    # key-side valid-length mask (d2l masked_softmax semantics)
    col = lax.broadcasted_iota(jnp.int32, (S, S), 1)
    mask = col < vl

    for h in range(num_heads):
        q_h = qkv_scr[:, h * head_dim:(h + 1) * head_dim].astype(jnp.bfloat16)
        k_h = qkv_scr[:, hidden + h * head_dim:
                      hidden + (h + 1) * head_dim].astype(jnp.bfloat16)
        v_h = qkv_scr[:, 2 * hidden + h * head_dim:
                      2 * hidden + (h + 1) * head_dim].astype(jnp.bfloat16)
        # scores: contract over head_dim without materializing k.T
        s = lax.dot_general(q_h, k_h, (((1,), (1,)), ((), ())),
                            preferred_element_type=jnp.float32) * scale   # (S, S)
        s = jnp.where(mask, s, -1e6)
        s = s - jnp.max(s, axis=-1, keepdims=True)
        p = jnp.exp(s)
        p = p * pl.reciprocal(jnp.sum(p, axis=-1, keepdims=True), approx=True)
        ctx_h = jnp.dot(p.astype(jnp.bfloat16), v_h,
                        preferred_element_type=jnp.float32)               # (S, Dh)
        # concat-heads layout: lane slice h of the (S, H) context scratch
        ctx_scr[:, h * head_dim:(h + 1) * head_dim] = ctx_h.astype(ctx_scr.dtype)

    # single full-depth output projection (replaces the per-head K=Dh dot chain)
    proj = jnp.dot(ctx_scr[...], wo_ref[...],
                   preferred_element_type=jnp.float32)                    # (S, H) f32

    # fused AddNorm1: LayerNorm(residual + proj + bias), f32 math
    y = x.astype(jnp.float32) + proj + bo_ref[...]
    mean = jnp.mean(y, axis=-1, keepdims=True)
    var = jnp.mean(jnp.square(y - mean), axis=-1, keepdims=True)
    y = (y - mean) * lax.rsqrt(var + eps)
    o_ref[0] = (y * g_ref[...] + bn_ref[...]).astype(o_ref.dtype)


def attention_addnorm(x, valid_lens, wqkv, bqkv, wo, bo, gamma, beta,
                      *, num_heads, eps=1e-5):
    """x: (B, S, H) bf16; wqkv: (H, 3H); wo: (H, H) -> LayerNorm(x + MHA(x) Wo + bo)."""
    B, S, H = x.shape
    Dh = H // num_heads
    scale = 1.0 / math.sqrt(Dh)

    cost = pl.CostEstimate(
        flops=B * (2 * S * H * 3 * H + 4 * num_heads * S * S * Dh + 2 * S * H * H),
        transcendentals=B * num_heads * S * S,
        bytes_accessed=2 * (2 * B * S * H + 3 * H * H + H * H) + 4 * 6 * H)

    return pl.pallas_call(
        functools.partial(_attn_block_kernel, scale=scale, eps=eps,
                          num_heads=num_heads, head_dim=Dh),
        out_shape=jax.ShapeDtypeStruct((B, S, H), jnp.bfloat16),
        grid_spec=pltpu.PrefetchScalarGridSpec(
            num_scalar_prefetch=1,
            grid=(B,),
            in_specs=[
                pl.BlockSpec((1, S, H), lambda b, vl: (b, 0, 0)),
                pl.BlockSpec((H, 3 * H), lambda b, vl: (0, 0)),
                pl.BlockSpec((1, 3 * H), lambda b, vl: (0, 0)),
                pl.BlockSpec((H, H), lambda b, vl: (0, 0)),
                pl.BlockSpec((1, H), lambda b, vl: (0, 0)),
                pl.BlockSpec((1, H), lambda b, vl: (0, 0)),
                pl.BlockSpec((1, H), lambda b, vl: (0, 0)),
            ],
            out_specs=pl.BlockSpec((1, S, H), lambda b, vl: (b, 0, 0)),
            scratch_shapes=[pltpu.VMEM((S, 3 * H), jnp.float32),
                            pltpu.VMEM((S, H), jnp.bfloat16)],
        ),
        compiler_params=pltpu.CompilerParams(
            dimension_semantics=("parallel",),
            vmem_limit_bytes=_vmem_limit()),
        cost_estimate=cost,
    )(valid_lens.astype(jnp.int32), x.astype(jnp.bfloat16),
      wqkv.astype(jnp.bfloat16), bqkv.astype(jnp.float32).reshape(1, 3 * H),
      wo.astype(jnp.bfloat16), bo.astype(jnp.float32).reshape(1, H),
      gamma.astype(jnp.float32).reshape(1, H), beta.astype(jnp.float32).reshape(1, H))


# ----------------------------- parameter init -----------------------------

def _dense_params(key, d_in, d_out, w_dtype=jnp.bfloat16):
    kw, kb = jax.random.split(key)
    w = (jax.random.normal(kw, (d_in, d_out), jnp.float32) * 0.02).astype(w_dtype)
    b = jax.random.normal(kb, (d_out,), jnp.float32) * 0.02
    return {"w": w, "b": b}


def init_bert_params(key, *, vocab_size, num_hiddens, ffn_num_hiddens,
                     num_heads, num_layers, max_len):
    keys = iter(jax.random.split(key, 16 + 8 * num_layers))
    p = {
        "tok_emb": jax.random.normal(next(keys), (vocab_size, num_hiddens), jnp.float32) * 0.02,
        "seg_emb": jax.random.normal(next(keys), (2, num_hiddens), jnp.float32) * 0.02,
        "pos_emb": jax.random.normal(next(keys), (1, max_len, num_hiddens), jnp.float32),
        "layers": [],
    }
    for _ in range(num_layers):
        layer = {
            "wqkv": _dense_params(next(keys), num_hiddens, 3 * num_hiddens),  # fused Q|K|V
            "wo": _dense_params(next(keys), num_hiddens, num_hiddens),
            "ln1_g": jnp.ones((num_hiddens,), jnp.float32),
            "ln1_b": jnp.zeros((num_hiddens,), jnp.float32),
            "ffn1": _dense_params(next(keys), num_hiddens, ffn_num_hiddens),
            "ffn2": _dense_params(next(keys), ffn_num_hiddens, num_hiddens),
            "ln2_g": jnp.ones((num_hiddens,), jnp.float32),
            "ln2_b": jnp.zeros((num_hiddens,), jnp.float32),
        }
        p["layers"].append(layer)
    p["hidden"] = _dense_params(next(keys), num_hiddens, num_hiddens)
    p["mlm1"] = _dense_params(next(keys), num_hiddens, num_hiddens)
    p["mlm_ln_g"] = jnp.ones((num_hiddens,), jnp.float32)
    p["mlm_ln_b"] = jnp.zeros((num_hiddens,), jnp.float32)
    p["mlm2"] = _dense_params(next(keys), num_hiddens, vocab_size)
    p["nsp"] = _dense_params(next(keys), num_hiddens, 2, w_dtype=jnp.float32)
    return p


# ----------------------------- model forward -----------------------------

def encoder_block(X, valid_lens, lp, num_heads):
    B, S, H = X.shape
    # fused QKV projection + multi-head attention + output projection + AddNorm1
    Y = attention_addnorm(X, valid_lens, lp["wqkv"]["w"], lp["wqkv"]["b"],
                          lp["wo"]["w"], lp["wo"]["b"], lp["ln1_g"], lp["ln1_b"],
                          num_heads=num_heads)                        # (B, S, H) bf16
    Yf = Y.reshape(B * S, H)

    # FFN: linear+relu, then linear fused with residual add + LayerNorm (AddNorm2)
    h1 = linear(Yf, lp["ffn1"]["w"], lp["ffn1"]["b"], activation="relu")
    Z = linear_layernorm(h1, lp["ffn2"]["w"], lp["ffn2"]["b"],
                         lp["ln2_g"], lp["ln2_b"], residual=Yf)
    return Z.reshape(B, S, H)


def bert_forward(params, tokens, segments, valid_lens, pred_positions, *, num_heads):
    B, S = tokens.shape
    # ----- encoder (embedding gathers stay in plain JAX) -----
    X = params["tok_emb"][tokens] + params["seg_emb"][segments]
    X = X + params["pos_emb"][:, :S, :]
    X = X.astype(jnp.bfloat16)                                        # bf16 activations
    for lp in params["layers"]:
        X = encoder_block(X, valid_lens, lp, num_heads)
    encoded_X = X                                                     # (B, S, H) bf16

    # ----- MaskLM head -----
    num_pred = pred_positions.shape[1]
    batch_idx = jnp.repeat(jnp.arange(B), num_pred)
    flat_pos = pred_positions.reshape(-1)
    masked_X = encoded_X[batch_idx, flat_pos]                         # (B*num_pred, H)
    h = linear_layernorm(masked_X, params["mlm1"]["w"], params["mlm1"]["b"],
                         params["mlm_ln_g"], params["mlm_ln_b"],
                         activation="relu")                           # Linear->ReLU->LN fused
    mlm_Y_hat = linear(h, params["mlm2"]["w"], params["mlm2"]["b"],
                       out_dtype=jnp.float32)                         # vocab logits
    mlm_Y_hat = mlm_Y_hat.reshape(B, num_pred, -1)

    # ----- NextSentencePred head -----
    cls = encoded_X[:, 0, :]                                          # (B, H)
    pooled = linear(cls, params["hidden"]["w"], params["hidden"]["b"],
                    activation="tanh", out_dtype=jnp.float32)
    # tiny (H -> 2) projection: plain JAX (2-lane output not worth a pallas_call)
    nsp_Y_hat = pooled @ params["nsp"]["w"] + params["nsp"]["b"]

    return encoded_X, mlm_Y_hat, nsp_Y_hat


# ----------------------------- main -----------------------------

if __name__ == "__main__":
    vocab_size = 128
    num_hiddens = 128
    ffn_num_hiddens = 256
    num_heads = 4
    num_layers = 2
    max_len = 64
    B, S, num_pred = 2, 8, 3

    key = jax.random.PRNGKey(0)
    kp, kt, ks, kpp = jax.random.split(key, 4)

    params = init_bert_params(
        kp, vocab_size=vocab_size, num_hiddens=num_hiddens,
        ffn_num_hiddens=ffn_num_hiddens, num_heads=num_heads,
        num_layers=num_layers, max_len=max_len)

    tokens = jax.random.randint(kt, (B, S), 0, vocab_size, dtype=jnp.int32)
    segments = jax.random.randint(ks, (B, S), 0, 2, dtype=jnp.int32)
    valid_lens = jnp.array([S, 5], dtype=jnp.int32)
    pred_positions = jax.random.randint(kpp, (B, num_pred), 0, S, dtype=jnp.int32)

    fwd = jax.jit(functools.partial(bert_forward, num_heads=num_heads))
    encoded_X, mlm_Y_hat, nsp_Y_hat = fwd(params, tokens, segments, valid_lens, pred_positions)
    jax.block_until_ready((encoded_X, mlm_Y_hat, nsp_Y_hat))

    assert encoded_X.shape == (B, S, num_hiddens)
    assert mlm_Y_hat.shape == (B, num_pred, vocab_size)
    assert nsp_Y_hat.shape == (B, 2)
    print("KERNEL_OK")
</pallas_src>

<mosaic_0001>
module attributes {stable_mosaic.version = 11 : i64} {
  func.func @_linear_norm_kernel(%arg0: i32, %arg1: i32, %arg2: memref<16x256xbf16, #tpu.memory_space<vmem>>, %arg3: memref<256x128xbf16, #tpu.memory_space<vmem>>, %arg4: memref<1x128xf32, #tpu.memory_space<vmem>>, %arg5: memref<16x128xbf16, #tpu.memory_space<vmem>>, %arg6: memref<1x128xf32, #tpu.memory_space<vmem>>, %arg7: memref<1x128xf32, #tpu.memory_space<vmem>>, %arg8: memref<16x128xbf16, #tpu.memory_space<vmem>>, %arg9: memref<16x128xf32, #tpu.memory_space<vmem>>) attributes {dimension_semantics = [#tpu.dimension_semantics<parallel>, #tpu.dimension_semantics<arbitrary>], iteration_bounds = array<i64: 1, 1>, scalar_prefetch = 0 : i64, scratch_operands = 1 : i64, tpu.core_type = #tpu.core_type<tc>, window_params = [{transform_indices = @transform_0, window_bounds = array<i64: 16, 256>}, {transform_indices = @transform_1, window_bounds = array<i64: 256, 128>}, {pipeline_mode = #tpu.pipeline_mode<synchronous>, transform_indices = @transform_2, window_bounds = array<i64: 1, 128>}, {transform_indices = @transform_3, window_bounds = array<i64: 16, 128>}, {pipeline_mode = #tpu.pipeline_mode<synchronous>, transform_indices = @transform_4, window_bounds = array<i64: 1, 128>}, {pipeline_mode = #tpu.pipeline_mode<synchronous>, transform_indices = @transform_5, window_bounds = array<i64: 1, 128>}, {transform_indices = @transform_6, window_bounds = array<i64: 16, 128>}]} {
    %c0_i32 = arith.constant 0 : i32
    %0 = arith.cmpi eq, %arg1, %c0_i32 : i32
    %1 = arith.extui %0 : i1 to i32
    %c0_i32_0 = arith.constant 0 : i32
    %2 = arith.cmpi ne, %1, %c0_i32_0 : i32
    scf.if %2 {
      %cst_10 = arith.constant 0.000000e+00 : f32
      %12 = vector.broadcast %cst_10 : f32 to vector<16x128xf32>
      %c0_11 = arith.constant 0 : index
      %c0_12 = arith.constant 0 : index
      %13 = vector.load %arg9[%c0_11, %c0_12] : memref<16x128xf32, #tpu.memory_space<vmem>>, vector<16x128xf32>
      tpu.vector_store %arg9[%c0_11, %c0_12], %12 {strides = array<i32>} : memref<16x128xf32, #tpu.memory_space<vmem>>, vector<16x128xf32>,
    } else {
    }
    %c0 = arith.constant 0 : index
    %c0_1 = arith.constant 0 : index
    %3 = vector.load %arg9[%c0, %c0_1] : memref<16x128xf32, #tpu.memory_space<vmem>>, vector<16x128xf32>
    %c0_2 = arith.constant 0 : index
    %c0_3 = arith.constant 0 : index
    %4 = vector.load %arg2[%c0_2, %c0_3] : memref<16x256xbf16, #tpu.memory_space<vmem>>, vector<16x256xbf16>
    %c0_4 = arith.constant 0 : index
    %c0_5 = arith.constant 0 : index
    %5 = vector.load %arg3[%c0_4, %c0_5] : memref<256x128xbf16, #tpu.memory_space<vmem>>, vector<256x128xbf16>
    %cst = arith.constant dense<0.000000e+00> : vector<16x128xf32>
    %6 = tpu.matmul %4, %5, %cst {dimension_numbers = #tpu.dot_dimension_numbers<[1], [0], [0], [1], [0, 0, 1, 1], [], []>} : vector<16x256xbf16>, vector<256x128xbf16>, vector<16x128xf32> -> vector<16x128xf32>
    %7 = arith.addf %3, %6 : vector<16x128xf32>
    %c0_6 = arith.constant 0 : index
    %c0_7 = arith.constant 0 : index
    %8 = vector.load %arg9[%c0_6, %c0_7] : memref<16x128xf32, #tpu.memory_space<vmem>>, vector<16x128xf32>
    tpu.vector_store %arg9[%c0_6, %c0_7], %7 {strides = array<i32>} : memref<16x128xf32, #tpu.memory_space<vmem>>, vector<16x128xf32>,
    %c0_i32_8 = arith.constant 0 : i32
    %9 = arith.cmpi eq, %arg1, %c0_i32_8 : i32
    %10 = arith.extui %9 : i1 to i32
    %c0_i32_9 = arith.constant 0 : i32
    %11 = arith.cmpi ne, %10, %c0_i32_9 : i32
    scf.if %11 {
      %c0_10 = arith.constant 0 : index
      %c0_11 = arith.constant 0 : index
      %12 = vector.load %arg9[%c0_10, %c0_11] : memref<16x128xf32, #tpu.memory_space<vmem>>, vector<16x128xf32>
      %c0_12 = arith.constant 0 : index
      %c0_13 = arith.constant 0 : index
      %13 = vector.load %arg4[%c0_12, %c0_13] : memref<1x128xf32, #tpu.memory_space<vmem>>, vector<1x128xf32>
      %14 = vector.broadcast %13 : vector<1x128xf32> to vector<16x128xf32>
      %15 = arith.addf %12, %14 : vector<16x128xf32>
      %c0_14 = arith.constant 0 : index
      %c0_15 = arith.constant 0 : index
      %16 = vector.load %arg5[%c0_14, %c0_15] : memref<16x128xbf16, #tpu.memory_space<vmem>>, vector<16x128xbf16>
      %17 = arith.extf %16 : vector<16x128xbf16> to vector<16x128xf32>
      %18 = arith.addf %15, %17 : vector<16x128xf32>
      %cst_16 = arith.constant dense<0.000000e+00> : vector<16xf32>
      %19 = vector.multi_reduction <add>, %18, %cst_16 [1] : vector<16x128xf32> to vector<16xf32>
      %20 = vector.shape_cast %19 : vector<16xf32> to vector<16x1xf32>
      %cst_17 = arith.constant 1.280000e+02 : f32
      %21 = vector.broadcast %cst_17 : f32 to vector<16x1xf32>
      %22 = arith.divf %20, %21 : vector<16x1xf32>
      %23 = vector.broadcast %22 : vector<16x1xf32> to vector<16x128xf32>
      %24 = arith.subf %18, %23 : vector<16x128xf32>
      %25 = arith.mulf %24, %24 : vector<16x128xf32>
      %cst_18 = arith.constant dense<0.000000e+00> : vector<16xf32>
      %26 = vector.multi_reduction <add>, %25, %cst_18 [1] : vector<16x128xf32> to vector<16xf32>
      %27 = vector.shape_cast %26 : vector<16xf32> to vector<16x1xf32>
      %cst_19 = arith.constant 1.280000e+02 : f32
      %28 = vector.broadcast %cst_19 : f32 to vector<16x1xf32>
      %29 = arith.divf %27, %28 : vector<16x1xf32>
      %30 = vector.broadcast %22 : vector<16x1xf32> to vector<16x128xf32>
      %31 = arith.subf %18, %30 : vector<16x128xf32>
      %cst_20 = arith.constant 9.99999974E-6 : f32
      %32 = vector.broadcast %cst_20 : f32 to vector<16x1xf32>
      %33 = arith.addf %29, %32 : vector<16x1xf32>
      %34 = math.rsqrt %33 : vector<16x1xf32>
      %35 = vector.broadcast %34 : vector<16x1xf32> to vector<16x128xf32>
      %36 = arith.mulf %31, %35 : vector<16x128xf32>
      %c0_21 = arith.constant 0 : index
      %c0_22 = arith.constant 0 : index
      %37 = vector.load %arg6[%c0_21, %c0_22] : memref<1x128xf32, #tpu.memory_space<vmem>>, vector<1x128xf32>
      %38 = vector.broadcast %37 : vector<1x128xf32> to vector<16x128xf32>
      %39 = arith.mulf %36, %38 : vector<16x128xf32>
      %c0_23 = arith.constant 0 : index
      %c0_24 = arith.constant 0 : index
      %40 = vector.load %arg7[%c0_23, %c0_24] : memref<1x128xf32, #tpu.memory_space<vmem>>, vector<1x128xf32>
      %41 = vector.broadcast %40 : vector<1x128xf32> to vector<16x128xf32>
      %42 = arith.addf %39, %41 : vector<16x128xf32>
      %43 = arith.truncf %42 : vector<16x128xf32> to vector<16x128xbf16>
      %c0_25 = arith.constant 0 : index
      %c0_26 = arith.constant 0 : index
      %44 = vector.load %arg8[%c0_25, %c0_26] : memref<16x128xbf16, #tpu.memory_space<vmem>>, vector<16x128xbf16>
      tpu.vector_store %arg8[%c0_25, %c0_26], %43 {strides = array<i32>} : memref<16x128xbf16, #tpu.memory_space<vmem>>, vector<16x128xbf16>,
    } else {
    }
    return
  }
  func.func @transform_0(%arg0: i32, %arg1: i32) -> (i32, i32) {
    %c0_i32 = arith.constant 0 : i32
    return %arg0, %arg1 : i32, i32
  }
  func.func @transform_1(%arg0: i32, %arg1: i32) -> (i32, i32) {
    %c0_i32 = arith.constant 0 : i32
    %c0_i32_0 = arith.constant 0 : i32
    return %arg1, %c0_i32 : i32, i32
  }
  func.func @transform_2(%arg0: i32, %arg1: i32) -> (i32, i32) {
    %c0_i32 = arith.constant 0 : i32
    %c0_i32_0 = arith.constant 0 : i32
    %c0_i32_1 = arith.constant 0 : i32
    return %c0_i32, %c0_i32_0 : i32, i32
  }
  func.func @transform_3(%arg0: i32, %arg1: i32) -> (i32, i32) {
    %c0_i32 = arith.constant 0 : i32
    %c0_i32_0 = arith.constant 0 : i32
    return %arg0, %c0_i32 : i32, i32
  }
  func.func @transform_4(%arg0: i32, %arg1: i32) -> (i32, i32) {
    %c0_i32 = arith.constant 0 : i32
    %c0_i32_0 = arith.constant 0 : i32
    %c0_i32_1 = arith.constant 0 : i32
    return %c0_i32, %c0_i32_0 : i32, i32
  }
  func.func @transform_5(%arg0: i32, %arg1: i32) -> (i32, i32) {
    %c0_i32 = arith.constant 0 : i32
    %c0_i32_0 = arith.constant 0 : i32
    %c0_i32_1 = arith.constant 0 : i32
    return %c0_i32, %c0_i32_0 : i32, i32
  }
  func.func @transform_6(%arg0: i32, %arg1: i32) -> (i32, i32) {
    %c0_i32 = arith.constant 0 : i32
    %c0_i32_0 = arith.constant 0 : i32
    return %arg0, %c0_i32 : i32, i32
  }
}

module attributes {stable_mosaic.version = 11 : i64} {
  func.func @_linear_kernel(%arg0: i32, %arg1: i32, %arg2: i32, %arg3: memref<16x128xbf16, #tpu.memory_space<vmem>>, %arg4: memref<128x256xbf16, #tpu.memory_space<vmem>>, %arg5: memref<1x256xf32, #tpu.memory_space<vmem>>, %arg6: memref<16x256xbf16, #tpu.memory_space<vmem>>, %arg7: memref<16x256xf32, #tpu.memory_space<vmem>>) attributes {dimension_semantics = [#tpu.dimension_semantics<parallel>, #tpu.dimension_semantics<parallel>, #tpu.dimension_semantics<arbitrary>], iteration_bounds = array<i64: 1, 1, 1>, scalar_prefetch = 0 : i64, scratch_operands = 1 : i64, tpu.core_type = #tpu.core_type<tc>, window_params = [{transform_indices = @transform_0, window_bounds = array<i64: 16, 128>}, {transform_indices = @transform_1, window_bounds = array<i64: 128, 256>}, {transform_indices = @transform_2, window_bounds = array<i64: 1, 256>}, {transform_indices = @transform_3, window_bounds = array<i64: 16, 256>}]} {
    %c0_i32 = arith.constant 0 : i32
    %0 = arith.cmpi eq, %arg2, %c0_i32 : i32
    %1 = arith.extui %0 : i1 to i32
    %c0_i32_0 = arith.constant 0 : i32
    %2 = arith.cmpi ne, %1, %c0_i32_0 : i32
    scf.if %2 {
      %cst_10 = arith.constant 0.000000e+00 : f32
      %12 = vector.broadcast %cst_10 : f32 to vector<16x256xf32>
      %c0_11 = arith.constant 0 : index
      %c0_12 = arith.constant 0 : index
      %13 = vector.load %arg7[%c0_11, %c0_12] : memref<16x256xf32, #tpu.memory_space<vmem>>, vector<16x256xf32>
      tpu.vector_store %arg7[%c0_11, %c0_12], %12 {strides = array<i32>} : memref<16x256xf32, #tpu.memory_space<vmem>>, vector<16x256xf32>,
    } else {
    }
    %c0 = arith.constant 0 : index
    %c0_1 = arith.constant 0 : index
    %3 = vector.load %arg7[%c0, %c0_1] : memref<16x256xf32, #tpu.memory_space<vmem>>, vector<16x256xf32>
    %c0_2 = arith.constant 0 : index
    %c0_3 = arith.constant 0 : index
    %4 = vector.load %arg3[%c0_2, %c0_3] : memref<16x128xbf16, #tpu.memory_space<vmem>>, vector<16x128xbf16>
    %c0_4 = arith.constant 0 : index
    %c0_5 = arith.constant 0 : index
    %5 = vector.load %arg4[%c0_4, %c0_5] : memref<128x256xbf16, #tpu.memory_space<vmem>>, vector<128x256xbf16>
    %cst = arith.constant dense<0.000000e+00> : vector<16x256xf32>
    %6 = tpu.matmul %4, %5, %cst {dimension_numbers = #tpu.dot_dimension_numbers<[1], [0], [0], [1], [0, 0, 1, 1], [], []>} : vector<16x128xbf16>, vector<128x256xbf16>, vector<16x256xf32> -> vector<16x256xf32>
    %7 = arith.addf %3, %6 : vector<16x256xf32>
    %c0_6 = arith.constant 0 : index
    %c0_7 = arith.constant 0 : index
    %8 = vector.load %arg7[%c0_6, %c0_7] : memref<16x256xf32, #tpu.memory_space<vmem>>, vector<16x256xf32>
    tpu.vector_store %arg7[%c0_6, %c0_7], %7 {strides = array<i32>} : memref<16x256xf32, #tpu.memory_space<vmem>>, vector<16x256xf32>,
    %c0_i32_8 = arith.constant 0 : i32
    %9 = arith.cmpi eq, %arg2, %c0_i32_8 : i32
    %10 = arith.extui %9 : i1 to i32
    %c0_i32_9 = arith.constant 0 : i32
    %11 = arith.cmpi ne, %10, %c0_i32_9 : i32
    scf.if %11 {
      %c0_10 = arith.constant 0 : index
      %c0_11 = arith.constant 0 : index
      %12 = vector.load %arg7[%c0_10, %c0_11] : memref<16x256xf32, #tpu.memory_space<vmem>>, vector<16x256xf32>
      %c0_12 = arith.constant 0 : index
      %c0_13 = arith.constant 0 : index
      %13 = vector.load %arg5[%c0_12, %c0_13] : memref<1x256xf32, #tpu.memory_space<vmem>>, vector<1x256xf32>
      %14 = vector.broadcast %13 : vector<1x256xf32> to vector<16x256xf32>
      %15 = arith.addf %12, %14 : vector<16x256xf32>
      %cst_14 = arith.constant 0.000000e+00 : f32
      %16 = vector.broadcast %cst_14 : f32 to vector<16x256xf32>
      %17 = arith.maximumf %15, %16 : vector<16x256xf32>
      %18 = arith.truncf %17 : vector<16x256xf32> to vector<16x256xbf16>
      %c0_15 = arith.constant 0 : index
      %c0_16 = arith.constant 0 : index
      %19 = vector.load %arg6[%c0_15, %c0_16] : memref<16x256xbf16, #tpu.memory_space<vmem>>, vector<16x256xbf16>
      tpu.vector_store %arg6[%c0_15, %c0_16], %18 {strides = array<i32>} : memref<16x256xbf16, #tpu.memory_space<vmem>>, vector<16x256xbf16>,
    } else {
    }
    return
  }
  func.func @transform_0(%arg0: i32, %arg1: i32, %arg2: i32) -> (i32, i32) {
    %c0_i32 = arith.constant 0 : i32
    return %arg0, %arg2 : i32, i32
  }
  func.func @transform_1(%arg0: i32, %arg1: i32, %arg2: i32) -> (i32, i32) {
    %c0_i32 = arith.constant 0 : i32
    return %arg2, %arg1 : i32, i32
  }
  func.func @transform_2(%arg0: i32, %arg1: i32, %arg2: i32) -> (i32, i32) {
    %c0_i32 = arith.constant 0 : i32
    %c0_i32_0 = arith.constant 0 : i32
    return %c0_i32, %arg1 : i32, i32
  }
  func.func @transform_3(%arg0: i32, %arg1: i32, %arg2: i32) -> (i32, i32) {
    %c0_i32 = arith.constant 0 : i32
    return %arg0, %arg1 : i32, i32
  }
}

module attributes {stable_mosaic.version = 11 : i64} {
  func.func @_attn_block_kernel(%arg0: i32, %arg1: memref<2xi32, #tpu.memory_space<smem>>, %arg2: memref<1x8x128xbf16, #tpu.memory_space<vmem>>, %arg3: memref<128x384xbf16, #tpu.memory_space<vmem>>, %arg4: memref<1x384xf32, #tpu.memory_space<vmem>>, %arg5: memref<128x128xbf16, #tpu.memory_space<vmem>>, %arg6: memref<1x128xf32, #tpu.memory_space<vmem>>, %arg7: memref<1x128xf32, #tpu.memory_space<vmem>>, %arg8: memref<1x128xf32, #tpu.memory_space<vmem>>, %arg9: memref<1x8x128xbf16, #tpu.memory_space<vmem>>, %arg10: memref<8x384xf32, #tpu.memory_space<vmem>>, %arg11: memref<8x128xbf16, #tpu.memory_space<vmem>>) attributes {dimension_semantics = [#tpu.dimension_semantics<parallel>], iteration_bounds = array<i64: 2>, scalar_prefetch = 1 : i64, scratch_operands = 2 : i64, tpu.core_type = #tpu.core_type<tc>, window_params = [{transform_indices = @transform_0, window_bounds = array<i64: 1, 8, 128>}, {pipeline_mode = #tpu.pipeline_mode<synchronous>, transform_indices = @transform_1, window_bounds = array<i64: 128, 384>}, {pipeline_mode = #tpu.pipeline_mode<synchronous>, transform_indices = @transform_2, window_bounds = array<i64: 1, 384>}, {pipeline_mode = #tpu.pipeline_mode<synchronous>, transform_indices = @transform_3, window_bounds = array<i64: 128, 128>}, {pipeline_mode = #tpu.pipeline_mode<synchronous>, transform_indices = @transform_4, window_bounds = array<i64: 1, 128>}, {pipeline_mode = #tpu.pipeline_mode<synchronous>, transform_indices = @transform_5, window_bounds = array<i64: 1, 128>}, {pipeline_mode = #tpu.pipeline_mode<synchronous>, transform_indices = @transform_6, window_bounds = array<i64: 1, 128>}, {transform_indices = @transform_7, window_bounds = array<i64: 1, 8, 128>}]} {
    %0 = arith.index_cast %arg0 : i32 to index
    %1 = memref.load %arg1[%0] : memref<2xi32, #tpu.memory_space<smem>>
    %c0 = arith.constant 0 : index
    %c0_0 = arith.constant 0 : index
    %c0_1 = arith.constant 0 : index
    %2 = vector.load %arg2[%c0, %c0_0, %c0_1] : memref<1x8x128xbf16, #tpu.memory_space<vmem>>, vector<1x8x128xbf16>
    %3 = vector.shape_cast %2 : vector<1x8x128xbf16> to vector<8x128xbf16>
    %c0_2 = arith.constant 0 : index
    %c0_3 = arith.constant 0 : index
    %4 = vector.load %arg3[%c0_2, %c0_3] : memref<128x384xbf16, #tpu.memory_space<vmem>>, vector<128x384xbf16>
    %cst = arith.constant dense<0.000000e+00> : vector<8x384xf32>
    %5 = tpu.matmul %3, %4, %cst {dimension_numbers = #tpu.dot_dimension_numbers<[1], [0], [0], [1], [0, 0, 1, 1], [], []>} : vector<8x128xbf16>, vector<128x384xbf16>, vector<8x384xf32> -> vector<8x384xf32>
    %c0_4 = arith.constant 0 : index
    %c0_5 = arith.constant 0 : index
    %6 = vector.load %arg4[%c0_4, %c0_5] : memref<1x384xf32, #tpu.memory_space<vmem>>, vector<1x384xf32>
    %7 = vector.broadcast %6 : vector<1x384xf32> to vector<8x384xf32>
    %8 = arith.addf %5, %7 : vector<8x384xf32>
    %c0_6 = arith.constant 0 : index
    %c0_7 = arith.constant 0 : index
    %9 = vector.load %arg10[%c0_6, %c0_7] : memref<8x384xf32, #tpu.memory_space<vmem>>, vector<8x384xf32>
    tpu.vector_store %arg10[%c0_6, %c0_7], %8 {strides = array<i32>} : memref<8x384xf32, #tpu.memory_space<vmem>>, vector<8x384xf32>,
    %10 = tpu.iota {dimensions = array<i32: 1>} : vector<8x8xi32>
    %11 = vector.broadcast %1 : i32 to vector<8x8xi32>
    %12 = arith.cmpi slt, %10, %11 : vector<8x8xi32>
    %c0_8 = arith.constant 0 : index
    %c0_9 = arith.constant 0 : index
    %13 = vector.load %arg10[%c0_8, %c0_9] : memref<8x384xf32, #tpu.memory_space<vmem>>, vector<8x32xf32>
    %14 = arith.truncf %13 : vector<8x32xf32> to vector<8x32xbf16>
    %c0_10 = arith.constant 0 : index
    %c128 = arith.constant 128 : index
    %15 = vector.load %arg10[%c0_10, %c128] : memref<8x384xf32, #tpu.memory_space<vmem>>, vector<8x32xf32>
    %16 = arith.truncf %15 : vector<8x32xf32> to vector<8x32xbf16>
    %c0_11 = arith.constant 0 : index
    %c256 = arith.constant 256 : index
    %17 = vector.load %arg10[%c0_11, %c256] : memref<8x384xf32, #tpu.memory_space<vmem>>, vector<8x32xf32>
    %18 = arith.truncf %17 : vector<8x32xf32> to vector<8x32xbf16>
    %cst_12 = arith.constant dense<0.000000e+00> : vector<8x8xf32>
    %19 = tpu.matmul %14, %16, %cst_12 {dimension_numbers = #tpu.dot_dimension_numbers<[1], [1], [0], [0], [0, 0, 1, 0], [], []>} : vector<8x32xbf16>, vector<8x32xbf16>, vector<8x8xf32> -> vector<8x8xf32>
    %cst_13 = arith.constant 0.176776692 : f32
    %20 = vector.broadcast %cst_13 : f32 to vector<8x8xf32>
    %21 = arith.mulf %19, %20 : vector<8x8xf32>
    %cst_14 = arith.constant -1.000000e+06 : f32
    %22 = vector.broadcast %cst_14 : f32 to vector<8x8xf32>
    %23 = arith.select %12, %21, %22 : vector<8x8xi1>, vector<8x8xf32>
    %cst_15 = arith.constant dense<0xFF800000> : vector<8xf32>
    %24 = vector.multi_reduction <maximumf>, %23, %cst_15 [1] : vector<8x8xf32> to vector<8xf32>
    %25 = vector.shape_cast %24 : vector<8xf32> to vector<8x1xf32>
    %26 = vector.broadcast %25 : vector<8x1xf32> to vector<8x8xf32>
    %27 = arith.subf %23, %26 : vector<8x8xf32>
    %28 = math.exp %27 : vector<8x8xf32>
    %cst_16 = arith.constant dense<0.000000e+00> : vector<8xf32>
    %29 = vector.multi_reduction <add>, %28, %cst_16 [1] : vector<8x8xf32> to vector<8xf32>
    %30 = vector.shape_cast %29 : vector<8xf32> to vector<8x1xf32>
    %31 = tpu.reciprocal %30 {approx = true} : vector<8x1xf32> -> vector<8x1xf32>
    %32 = vector.broadcast %31 : vector<8x1xf32> to vector<8x8xf32>
    %33 = arith.mulf %28, %32 : vector<8x8xf32>
    %34 = arith.truncf %33 : vector<8x8xf32> to vector<8x8xbf16>
    %cst_17 = arith.constant dense<0.000000e+00> : vector<8x32xf32>
    %35 = tpu.matmul %34, %18, %cst_17 {dimension_numbers = #tpu.dot_dimension_numbers<[1], [0], [0], [1], [0, 0, 1, 1], [], []>} : vector<8x8xbf16>, vector<8x32xbf16>, vector<8x32xf32> -> vector<8x32xf32>
    %36 = arith.truncf %35 : vector<8x32xf32> to vector<8x32xbf16>
    %c0_18 = arith.constant 0 : index
    %c0_19 = arith.constant 0 : index
    %37 = vector.load %arg11[%c0_18, %c0_19] : memref<8x128xbf16, #tpu.memory_space<vmem>>, vector<8x32xbf16>
    tpu.vector_store %arg11[%c0_18, %c0_19], %36 {strides = array<i32>} : memref<8x128xbf16, #tpu.memory_space<vmem>>, vector<8x32xbf16>,
    %c0_20 = arith.constant 0 : index
    %c32 = arith.constant 32 : index
    %38 = vector.load %arg10[%c0_20, %c32] : memref<8x384xf32, #tpu.memory_space<vmem>>, vector<8x32xf32>
    %39 = arith.truncf %38 : vector<8x32xf32> to vector<8x32xbf16>
    %c0_21 = arith.constant 0 : index
    %c160 = arith.constant 160 : index
    %40 = vector.load %arg10[%c0_21, %c160] : memref<8x384xf32, #tpu.memory_space<vmem>>, vector<8x32xf32>
    %41 = arith.truncf %40 : vector<8x32xf32> to vector<8x32xbf16>
    %c0_22 = arith.constant 0 : index
    %c288 = arith.constant 288 : index
    %42 = vector.load %arg10[%c0_22, %c288] : memref<8x384xf32, #tpu.memory_space<vmem>>, vector<8x32xf32>
    %43 = arith.truncf %42 : vector<8x32xf32> to vector<8x32xbf16>
    %cst_23 = arith.constant dense<0.000000e+00> : vector<8x8xf32>
    %44 = tpu.matmul %39, %41, %cst_23 {dimension_numbers = #tpu.dot_dimension_numbers<[1], [1], [0], [0], [0, 0, 1, 0], [], []>} : vector<8x32xbf16>, vector<8x32xbf16>, vector<8x8xf32> -> vector<8x8xf32>
    %cst_24 = arith.constant 0.176776692 : f32
    %45 = vector.broadcast %cst_24 : f32 to vector<8x8xf32>
    %46 = arith.mulf %44, %45 : vector<8x8xf32>
    %cst_25 = arith.constant -1.000000e+06 : f32
    %47 = vector.broadcast %cst_25 : f32 to vector<8x8xf32>
    %48 = arith.select %12, %46, %47 : vector<8x8xi1>, vector<8x8xf32>
    %cst_26 = arith.constant dense<0xFF800000> : vector<8xf32>
    %49 = vector.multi_reduction <maximumf>, %48, %cst_26 [1] : vector<8x8xf32> to vector<8xf32>
    %50 = vector.shape_cast %49 : vector<8xf32> to vector<8x1xf32>
    %51 = vector.broadcast %50 : vector<8x1xf32> to vector<8x8xf32>
    %52 = arith.subf %48, %51 : vector<8x8xf32>
    %53 = math.exp %52 : vector<8x8xf32>
    %cst_27 = arith.constant dense<0.000000e+00> : vector<8xf32>
    %54 = vector.multi_reduction <add>, %53, %cst_27 [1] : vector<8x8xf32> to vector<8xf32>
    %55 = vector.shape_cast %54 : vector<8xf32> to vector<8x1xf32>
    %56 = tpu.reciprocal %55 {approx = true} : vector<8x1xf32> -> vector<8x1xf32>
    %57 = vector.broadcast %56 : vector<8x1xf32> to vector<8x8xf32>
    %58 = arith.mulf %53, %57 : vector<8x8xf32>
    %59 = arith.truncf %58 : vector<8x8xf32> to vector<8x8xbf16>
    %cst_28 = arith.constant dense<0.000000e+00> : vector<8x32xf32>
    %60 = tpu.matmul %59, %43, %cst_28 {dimension_numbers = #tpu.dot_dimension_numbers<[1], [0], [0], [1], [0, 0, 1, 1], [], []>} : vector<8x8xbf16>, vector<8x32xbf16>, vector<8x32xf32> -> vector<8x32xf32>
    %61 = arith.truncf %60 : vector<8x32xf32> to vector<8x32xbf16>
    %c0_29 = arith.constant 0 : index
    %c32_30 = arith.constant 32 : index
    %62 = vector.load %arg11[%c0_29, %c32_30] : memref<8x128xbf16, #tpu.memory_space<vmem>>, vector<8x32xbf16>
    tpu.vector_store %arg11[%c0_29, %c32_30], %61 {strides = array<i32>} : memref<8x128xbf16, #tpu.memory_space<vmem>>, vector<8x32xbf16>,
    %c0_31 = arith.constant 0 : index
    %c64 = arith.constant 64 : index
    %63 = vector.load %arg10[%c0_31, %c64] : memref<8x384xf32, #tpu.memory_space<vmem>>, vector<8x32xf32>
    %64 = arith.truncf %63 : vector<8x32xf32> to vector<8x32xbf16>
    %c0_32 = arith.constant 0 : index
    %c192 = arith.constant 192 : index
    %65 = vector.load %arg10[%c0_32, %c192] : memref<8x384xf32, #tpu.memory_space<vmem>>, vector<8x32xf32>
    %66 = arith.truncf %65 : vector<8x32xf32> to vector<8x32xbf16>
    %c0_33 = arith.constant 0 : index
    %c320 = arith.constant 320 : index
    %67 = vector.load %arg10[%c0_33, %c320] : memref<8x384xf32, #tpu.memory_space<vmem>>, vector<8x32xf32>
    %68 = arith.truncf %67 : vector<8x32xf32> to vector<8x32xbf16>
    %cst_34 = arith.constant dense<0.000000e+00> : vector<8x8xf32>
    %69 = tpu.matmul %64, %66, %cst_34 {dimension_numbers = #tpu.dot_dimension_numbers<[1], [1], [0], [0], [0, 0, 1, 0], [], []>} : vector<8x32xbf16>, vector<8x32xbf16>, vector<8x8xf32> -> vector<8x8xf32>
    %cst_35 = arith.constant 0.176776692 : f32
    %70 = vector.broadcast %cst_35 : f32 to vector<8x8xf32>
    %71 = arith.mulf %69, %70 : vector<8x8xf32>
    %cst_36 = arith.constant -1.000000e+06 : f32
    %72 = vector.broadcast %cst_36 : f32 to vector<8x8xf32>
    %73 = arith.select %12, %71, %72 : vector<8x8xi1>, vector<8x8xf32>
    %cst_37 = arith.constant dense<0xFF800000> : vector<8xf32>
    %74 = vector.multi_reduction <maximumf>, %73, %cst_37 [1] : vector<8x8xf32> to vector<8xf32>
    %75 = vector.shape_cast %74 : vector<8xf32> to vector<8x1xf32>
    %76 = vector.broadcast %75 : vector<8x1xf32> to vector<8x8xf32>
    %77 = arith.subf %73, %76 : vector<8x8xf32>
    %78 = math.exp %77 : vector<8x8xf32>
    %cst_38 = arith.constant dense<0.000000e+00> : vector<8xf32>
    %79 = vector.multi_reduction <add>, %78, %cst_38 [1] : vector<8x8xf32> to vector<8xf32>
    %80 = vector.shape_cast %79 : vector<8xf32> to vector<8x1xf32>
    %81 = tpu.reciprocal %80 {approx = true} : vector<8x1xf32> -> vector<8x1xf32>
    %82 = vector.broadcast %81 : vector<8x1xf32> to vector<8x8xf32>
    %83 = arith.mulf %78, %82 : vector<8x8xf32>
    %84 = arith.truncf %83 : vector<8x8xf32> to vector<8x8xbf16>
    %cst_39 = arith.constant dense<0.000000e+00> : vector<8x32xf32>
    %85 = tpu.matmul %84, %68, %cst_39 {dimension_numbers = #tpu.dot_dimension_numbers<[1], [0], [0], [1], [0, 0, 1, 1], [], []>} : vector<8x8xbf16>, vector<8x32xbf16>, vector<8x32xf32> -> vector<8x32xf32>
    %86 = arith.truncf %85 : vector<8x32xf32> to vector<8x32xbf16>
    %c0_40 = arith.constant 0 : index
    %c64_41 = arith.constant 64 : index
    %87 = vector.load %arg11[%c0_40, %c64_41] : memref<8x128xbf16, #tpu.memory_space<vmem>>, vector<8x32xbf16>
    tpu.vector_store %arg11[%c0_40, %c64_41], %86 {strides = array<i32>} : memref<8x128xbf16, #tpu.memory_space<vmem>>, vector<8x32xbf16>,
    %c0_42 = arith.constant 0 : index
    %c96 = arith.constant 96 : index
    %88 = vector.load %arg10[%c0_42, %c96] : memref<8x384xf32, #tpu.memory_space<vmem>>, vector<8x32xf32>
    %89 = arith.truncf %88 : vector<8x32xf32> to vector<8x32xbf16>
    %c0_43 = arith.constant 0 : index
    %c224 = arith.constant 224 : index
    %90 = vector.load %arg10[%c0_43, %c224] : memref<8x384xf32, #tpu.memory_space<vmem>>, vector<8x32xf32>
    %91 = arith.truncf %90 : vector<8x32xf32> to vector<8x32xbf16>
    %c0_44 = arith.constant 0 : index
    %c352 = arith.constant 352 : index
    %92 = vector.load %arg10[%c0_44, %c352] : memref<8x384xf32, #tpu.memory_space<vmem>>, vector<8x32xf32>
    %93 = arith.truncf %92 : vector<8x32xf32> to vector<8x32xbf16>
    %cst_45 = arith.constant dense<0.000000e+00> : vector<8x8xf32>
    %94 = tpu.matmul %89, %91, %cst_45 {dimension_numbers = #tpu.dot_dimension_numbers<[1], [1], [0], [0], [0, 0, 1, 0], [], []>} : vector<8x32xbf16>, vector<8x32xbf16>, vector<8x8xf32> -> vector<8x8xf32>
    %cst_46 = arith.constant 0.176776692 : f32
    %95 = vector.broadcast %cst_46 : f32 to vector<8x8xf32>
    %96 = arith.mulf %94, %95 : vector<8x8xf32>
    %cst_47 = arith.constant -1.000000e+06 : f32
    %97 = vector.broadcast %cst_47 : f32 to vector<8x8xf32>
    %98 = arith.select %12, %96, %97 : vector<8x8xi1>, vector<8x8xf32>
    %cst_48 = arith.constant dense<0xFF800000> : vector<8xf32>
    %99 = vector.multi_reduction <maximumf>, %98, %cst_48 [1] : vector<8x8xf32> to vector<8xf32>
    %100 = vector.shape_cast %99 : vector<8xf32> to vector<8x1xf32>
    %101 = vector.broadcast %100 : vector<8x1xf32> to vector<8x8xf32>
    %102 = arith.subf %98, %101 : vector<8x8xf32>
    %103 = math.exp %102 : vector<8x8xf32>
    %cst_49 = arith.constant dense<0.000000e+00> : vector<8xf32>
    %104 = vector.multi_reduction <add>, %103, %cst_49 [1] : vector<8x8xf32> to vector<8xf32>
    %105 = vector.shape_cast %104 : vector<8xf32> to vector<8x1xf32>
    %106 = tpu.reciprocal %105 {approx = true} : vector<8x1xf32> -> vector<8x1xf32>
    %107 = vector.broadcast %106 : vector<8x1xf32> to vector<8x8xf32>
    %108 = arith.mulf %103, %107 : vector<8x8xf32>
    %109 = arith.truncf %108 : vector<8x8xf32> to vector<8x8xbf16>
    %cst_50 = arith.constant dense<0.000000e+00> : vector<8x32xf32>
    %110 = tpu.matmul %109, %93, %cst_50 {dimension_numbers = #tpu.dot_dimension_numbers<[1], [0], [0], [1], [0, 0, 1, 1], [], []>} : vector<8x8xbf16>, vector<8x32xbf16>, vector<8x32xf32> -> vector<8x32xf32>
    %111 = arith.truncf %110 : vector<8x32xf32> to vector<8x32xbf16>
    %c0_51 = arith.constant 0 : index
    %c96_52 = arith.constant 96 : index
    %112 = vector.load %arg11[%c0_51, %c96_52] : memref<8x128xbf16, #tpu.memory_space<vmem>>, vector<8x32xbf16>
    tpu.vector_store %arg11[%c0_51, %c96_52], %111 {strides = array<i32>} : memref<8x128xbf16, #tpu.memory_space<vmem>>, vector<8x32xbf16>,
    %c0_53 = arith.constant 0 : index
    %c0_54 = arith.constant 0 : index
    %113 = vector.load %arg11[%c0_53, %c0_54] : memref<8x128xbf16, #tpu.memory_space<vmem>>, vector<8x128xbf16>
    %c0_55 = arith.constant 0 : index
    %c0_56 = arith.constant 0 : index
    %114 = vector.load %arg5[%c0_55, %c0_56] : memref<128x128xbf16, #tpu.memory_space<vmem>>, vector<128x128xbf16>
    %cst_57 = arith.constant dense<0.000000e+00> : vector<8x128xf32>
    %115 = tpu.matmul %113, %114, %cst_57 {dimension_numbers = #tpu.dot_dimension_numbers<[1], [0], [0], [1], [0, 0, 1, 1], [], []>} : vector<8x128xbf16>, vector<128x128xbf16>, vector<8x128xf32> -> vector<8x128xf32>
    %116 = arith.extf %3 : vector<8x128xbf16> to vector<8x128xf32>
    %117 = arith.addf %116, %115 : vector<8x128xf32>
    %c0_58 = arith.constant 0 : index
    %c0_59 = arith.constant 0 : index
    %118 = vector.load %arg6[%c0_58, %c0_59] : memref<1x128xf32, #tpu.memory_space<vmem>>, vector<1x128xf32>
    %119 = vector.broadcast %118 : vector<1x128xf32> to vector<8x128xf32>
    %120 = arith.addf %117, %119 : vector<8x128xf32>
    %cst_60 = arith.constant dense<0.000000e+00> : vector<8xf32>
    %121 = vector.multi_reduction <add>, %120, %cst_60 [1] : vector<8x128xf32> to vector<8xf32>
    %122 = vector.shape_cast %121 : vector<8xf32> to vector<8x1xf32>
    %cst_61 = arith.constant 1.280000e+02 : f32
    %123 = vector.broadcast %cst_61 : f32 to vector<8x1xf32>
    %124 = arith.divf %122, %123 : vector<8x1xf32>
    %125 = vector.broadcast %124 : vector<8x1xf32> to vector<8x128xf32>
    %126 = arith.subf %120, %125 : vector<8x128xf32>
    %127 = arith.mulf %126, %126 : vector<8x128xf32>
    %cst_62 = arith.constant dense<0.000000e+00> : vector<8xf32>
    %128 = vector.multi_reduction <add>, %127, %cst_62 [1] : vector<8x128xf32> to vector<8xf32>
    %129 = vector.shape_cast %128 : vector<8xf32> to vector<8x1xf32>
    %cst_63 = arith.constant 1.280000e+02 : f32
    %130 = vector.broadcast %cst_63 : f32 to vector<8x1xf32>
    %131 = arith.divf %129, %130 : vector<8x1xf32>
    %132 = vector.broadcast %124 : vector<8x1xf32> to vector<8x128xf32>
    %133 = arith.subf %120, %132 : vector<8x128xf32>
    %cst_64 = arith.constant 9.99999974E-6 : f32
    %134 = vector.broadcast %cst_64 : f32 to vector<8x1xf32>
    %135 = arith.addf %131, %134 : vector<8x1xf32>
    %136 = math.rsqrt %135 : vector<8x1xf32>
    %137 = vector.broadcast %136 : vector<8x1xf32> to vector<8x128xf32>
    %138 = arith.mulf %133, %137 : vector<8x128xf32>
    %c0_65 = arith.constant 0 : index
    %c0_66 = arith.constant 0 : index
    %139 = vector.load %arg7[%c0_65, %c0_66] : memref<1x128xf32, #tpu.memory_space<vmem>>, vector<1x128xf32>
    %140 = vector.broadcast %139 : vector<1x128xf32> to vector<8x128xf32>
    %141 = arith.mulf %138, %140 : vector<8x128xf32>
    %c0_67 = arith.constant 0 : index
    %c0_68 = arith.constant 0 : index
    %142 = vector.load %arg8[%c0_67, %c0_68] : memref<1x128xf32, #tpu.memory_space<vmem>>, vector<1x128xf32>
    %143 = vector.broadcast %142 : vector<1x128xf32> to vector<8x128xf32>
    %144 = arith.addf %141, %143 : vector<8x128xf32>
    %145 = arith.truncf %144 : vector<8x128xf32> to vector<8x128xbf16>
    %c0_69 = arith.constant 0 : index
    %c0_70 = arith.constant 0 : index
    %c0_71 = arith.constant 0 : index
    %146 = vector.load %arg9[%c0_69, %c0_70, %c0_71] : memref<1x8x128xbf16, #tpu.memory_space<vmem>>, vector<1x8x128xbf16>
    %147 = vector.shape_cast %146 : vector<1x8x128xbf16> to vector<8x128xbf16>
    %148 = vector.shape_cast %145 : vector<8x128xbf16> to vector<1x8x128xbf16>
    tpu.vector_store %arg9[%c0_69, %c0_70, %c0_71], %148 {strides = array<i32>} : memref<1x8x128xbf16, #tpu.memory_space<vmem>>, vector<1x8x128xbf16>,
    return
  }
  func.func @transform_0(%arg0: i32, %arg1: memref<2xi32, #tpu.memory_space<smem>>) -> (i32, i32, i32) {
    %c0_i32 = arith.constant 0 : i32
    %c0_i32_0 = arith.constant 0 : i32
    %c0_i32_1 = arith.constant 0 : i32
    return %arg0, %c0_i32, %c0_i32_0 : i32, i32, i32
  }
  func.func @transform_1(%arg0: i32, %arg1: memref<2xi32, #tpu.memory_space<smem>>) -> (i32, i32) {
    %c0_i32 = arith.constant 0 : i32
    %c0_i32_0 = arith.constant 0 : i32
    %c0_i32_1 = arith.constant 0 : i32
    return %c0_i32, %c0_i32_0 : i32, i32
  }
  func.func @transform_2(%arg0: i32, %arg1: memref<2xi32, #tpu.memory_space<smem>>) -> (i32, i32) {
    %c0_i32 = arith.constant 0 : i32
    %c0_i32_0 = arith.constant 0 : i32
    %c0_i32_1 = arith.constant 0 : i32
    return %c0_i32, %c0_i32_0 : i32, i32
  }
  func.func @transform_3(%arg0: i32, %arg1: memref<2xi32, #tpu.memory_space<smem>>) -> (i32, i32) {
    %c0_i32 = arith.constant 0 : i32
    %c0_i32_0 = arith.constant 0 : i32
    %c0_i32_1 = arith.constant 0 : i32
    return %c0_i32, %c0_i32_0 : i32, i32
  }
  func.func @transform_4(%arg0: i32, %arg1: memref<2xi32, #tpu.memory_space<smem>>) -> (i32, i32) {
    %c0_i32 = arith.constant 0 : i32
    %c0_i32_0 = arith.constant 0 : i32
    %c0_i32_1 = arith.constant 0 : i32
    return %c0_i32, %c0_i32_0 : i32, i32
  }
  func.func @transform_5(%arg0: i32, %arg1: memref<2xi32, #tpu.memory_space<smem>>) -> (i32, i32) {
    %c0_i32 = arith.constant 0 : i32
    %c0_i32_0 = arith.constant 0 : i32
    %c0_i32_1 = arith.constant 0 : i32
    return %c0_i32, %c0_i32_0 : i32, i32
  }
  func.func @transform_6(%arg0: i32, %arg1: memref<2xi32, #tpu.memory_space<smem>>) -> (i32, i32) {
    %c0_i32 = arith.constant 0 : i32
    %c0_i32_0 = arith.constant 0 : i32
    %c0_i32_1 = arith.constant 0 : i32
    return %c0_i32, %c0_i32_0 : i32, i32
  }
  func.func @transform_7(%arg0: i32, %arg1: memref<2xi32, #tpu.memory_space<smem>>) -> (i32, i32, i32) {
    %c0_i32 = arith.constant 0 : i32
    %c0_i32_0 = arith.constant 0 : i32
    %c0_i32_1 = arith.constant 0 : i32
    return %arg0, %c0_i32, %c0_i32_0 : i32, i32, i32
  }
}

module attributes {stable_mosaic.version = 11 : i64} {
  func.func @_linear_norm_kernel(%arg0: i32, %arg1: i32, %arg2: memref<8x128xbf16, #tpu.memory_space<vmem>>, %arg3: memref<128x128xbf16, #tpu.memory_space<vmem>>, %arg4: memref<1x128xf32, #tpu.memory_space<vmem>>, %arg5: memref<1x128xf32, #tpu.memory_space<vmem>>, %arg6: memref<1x128xf32, #tpu.memory_space<vmem>>, %arg7: memref<8x128xbf16, #tpu.memory_space<vmem>>, %arg8: memref<8x128xf32, #tpu.memory_space<vmem>>) attributes {dimension_semantics = [#tpu.dimension_semantics<parallel>, #tpu.dimension_semantics<arbitrary>], iteration_bounds = array<i64: 1, 1>, scalar_prefetch = 0 : i64, scratch_operands = 1 : i64, tpu.core_type = #tpu.core_type<tc>, window_params = [{transform_indices = @transform_0, window_bounds = array<i64: 8, 128>}, {transform_indices = @transform_1, window_bounds = array<i64: 128, 128>}, {pipeline_mode = #tpu.pipeline_mode<synchronous>, transform_indices = @transform_2, window_bounds = array<i64: 1, 128>}, {pipeline_mode = #tpu.pipeline_mode<synchronous>, transform_indices = @transform_3, window_bounds = array<i64: 1, 128>}, {pipeline_mode = #tpu.pipeline_mode<synchronous>, transform_indices = @transform_4, window_bounds = array<i64: 1, 128>}, {transform_indices = @transform_5, window_bounds = array<i64: 8, 128>}]} {
    %c0_i32 = arith.constant 0 : i32
    %0 = arith.cmpi eq, %arg1, %c0_i32 : i32
    %1 = arith.extui %0 : i1 to i32
    %c0_i32_0 = arith.constant 0 : i32
    %2 = arith.cmpi ne, %1, %c0_i32_0 : i32
    scf.if %2 {
      %cst_10 = arith.constant 0.000000e+00 : f32
      %12 = vector.broadcast %cst_10 : f32 to vector<8x128xf32>
      %c0_11 = arith.constant 0 : index
      %c0_12 = arith.constant 0 : index
      %13 = vector.load %arg8[%c0_11, %c0_12] : memref<8x128xf32, #tpu.memory_space<vmem>>, vector<8x128xf32>
      tpu.vector_store %arg8[%c0_11, %c0_12], %12 {strides = array<i32>} : memref<8x128xf32, #tpu.memory_space<vmem>>, vector<8x128xf32>,
    } else {
    }
    %c0 = arith.constant 0 : index
    %c0_1 = arith.constant 0 : index
    %3 = vector.load %arg8[%c0, %c0_1] : memref<8x128xf32, #tpu.memory_space<vmem>>, vector<8x128xf32>
    %c0_2 = arith.constant 0 : index
    %c0_3 = arith.constant 0 : index
    %4 = vector.load %arg2[%c0_2, %c0_3] : memref<8x128xbf16, #tpu.memory_space<vmem>>, vector<8x128xbf16>
    %c0_4 = arith.constant 0 : index
    %c0_5 = arith.constant 0 : index
    %5 = vector.load %arg3[%c0_4, %c0_5] : memref<128x128xbf16, #tpu.memory_space<vmem>>, vector<128x128xbf16>
    %cst = arith.constant dense<0.000000e+00> : vector<8x128xf32>
    %6 = tpu.matmul %4, %5, %cst {dimension_numbers = #tpu.dot_dimension_numbers<[1], [0], [0], [1], [0, 0, 1, 1], [], []>} : vector<8x128xbf16>, vector<128x128xbf16>, vector<8x128xf32> -> vector<8x128xf32>
    %7 = arith.addf %3, %6 : vector<8x128xf32>
    %c0_6 = arith.constant 0 : index
    %c0_7 = arith.constant 0 : index
    %8 = vector.load %arg8[%c0_6, %c0_7] : memref<8x128xf32, #tpu.memory_space<vmem>>, vector<8x128xf32>
    tpu.vector_store %arg8[%c0_6, %c0_7], %7 {strides = array<i32>} : memref<8x128xf32, #tpu.memory_space<vmem>>, vector<8x128xf32>,
    %c0_i32_8 = arith.constant 0 : i32
    %9 = arith.cmpi eq, %arg1, %c0_i32_8 : i32
    %10 = arith.extui %9 : i1 to i32
    %c0_i32_9 = arith.constant 0 : i32
    %11 = arith.cmpi ne, %10, %c0_i32_9 : i32
    scf.if %11 {
      %c0_10 = arith.constant 0 : index
      %c0_11 = arith.constant 0 : index
      %12 = vector.load %arg8[%c0_10, %c0_11] : memref<8x128xf32, #tpu.memory_space<vmem>>, vector<8x128xf32>
      %c0_12 = arith.constant 0 : index
      %c0_13 = arith.constant 0 : index
      %13 = vector.load %arg4[%c0_12, %c0_13] : memref<1x128xf32, #tpu.memory_space<vmem>>, vector<1x128xf32>
      %14 = vector.broadcast %13 : vector<1x128xf32> to vector<8x128xf32>
      %15 = arith.addf %12, %14 : vector<8x128xf32>
      %cst_14 = arith.constant 0.000000e+00 : f32
      %16 = vector.broadcast %cst_14 : f32 to vector<8x128xf32>
      %17 = arith.maximumf %15, %16 : vector<8x128xf32>
      %cst_15 = arith.constant dense<0.000000e+00> : vector<8xf32>
      %18 = vector.multi_reduction <add>, %17, %cst_15 [1] : vector<8x128xf32> to vector<8xf32>
      %19 = vector.shape_cast %18 : vector<8xf32> to vector<8x1xf32>
      %cst_16 = arith.constant 1.280000e+02 : f32
      %20 = vector.broadcast %cst_16 : f32 to vector<8x1xf32>
      %21 = arith.divf %19, %20 : vector<8x1xf32>
      %22 = vector.broadcast %21 : vector<8x1xf32> to vector<8x128xf32>
      %23 = arith.subf %17, %22 : vector<8x128xf32>
      %24 = arith.mulf %23, %23 : vector<8x128xf32>
      %cst_17 = arith.constant dense<0.000000e+00> : vector<8xf32>
      %25 = vector.multi_reduction <add>, %24, %cst_17 [1] : vector<8x128xf32> to vector<8xf32>
      %26 = vector.shape_cast %25 : vector<8xf32> to vector<8x1xf32>
      %cst_18 = arith.constant 1.280000e+02 : f32
      %27 = vector.broadcast %cst_18 : f32 to vector<8x1xf32>
      %28 = arith.divf %26, %27 : vector<8x1xf32>
      %29 = vector.broadcast %21 : vector<8x1xf32> to vector<8x128xf32>
      %30 = arith.subf %17, %29 : vector<8x128xf32>
      %cst_19 = arith.constant 9.99999974E-6 : f32
      %31 = vector.broadcast %cst_19 : f32 to vector<8x1xf32>
      %32 = arith.addf %28, %31 : vector<8x1xf32>
      %33 = math.rsqrt %32 : vector<8x1xf32>
      %34 = vector.broadcast %33 : vector<8x1xf32> to vector<8x128xf32>
      %35 = arith.mulf %30, %34 : vector<8x128xf32>
      %c0_20 = arith.constant 0 : index
      %c0_21 = arith.constant 0 : index
      %36 = vector.load %arg5[%c0_20, %c0_21] : memref<1x128xf32, #tpu.memory_space<vmem>>, vector<1x128xf32>
      %37 = vector.broadcast %36 : vector<1x128xf32> to vector<8x128xf32>
      %38 = arith.mulf %35, %37 : vector<8x128xf32>
      %c0_22 = arith.constant 0 : index
      %c0_23 = arith.constant 0 : index
      %39 = vector.load %arg6[%c0_22, %c0_23] : memref<1x128xf32, #tpu.memory_space<vmem>>, vector<1x128xf32>
      %40 = vector.broadcast %39 : vector<1x128xf32> to vector<8x128xf32>
      %41 = arith.addf %38, %40 : vector<8x128xf32>
      %42 = arith.truncf %41 : vector<8x128xf32> to vector<8x128xbf16>
      %c0_24 = arith.constant 0 : index
      %c0_25 = arith.constant 0 : index
      %43 = vector.load %arg7[%c0_24, %c0_25] : memref<8x128xbf16, #tpu.memory_space<vmem>>, vector<8x128xbf16>
      tpu.vector_store %arg7[%c0_24, %c0_25], %42 {strides = array<i32>} : memref<8x128xbf16, #tpu.memory_space<vmem>>, vector<8x128xbf16>,
    } else {
    }
    return
  }
  func.func @transform_0(%arg0: i32, %arg1: i32) -> (i32, i32) {
    %c0_i32 = arith.constant 0 : i32
    return %arg0, %arg1 : i32, i32
  }
  func.func @transform_1(%arg0: i32, %arg1: i32) -> (i32, i32) {
    %c0_i32 = arith.constant 0 : i32
    %c0_i32_0 = arith.constant 0 : i32
    return %arg1, %c0_i32 : i32, i32
  }
  func.func @transform_2(%arg0: i32, %arg1: i32) -> (i32, i32) {
    %c0_i32 = arith.constant 0 : i32
    %c0_i32_0 = arith.constant 0 : i32
    %c0_i32_1 = arith.constant 0 : i32
    return %c0_i32, %c0_i32_0 : i32, i32
  }
  func.func @transform_3(%arg0: i32, %arg1: i32) -> (i32, i32) {
    %c0_i32 = arith.constant 0 : i32
    %c0_i32_0 = arith.constant 0 : i32
    %c0_i32_1 = arith.constant 0 : i32
    return %c0_i32, %c0_i32_0 : i32, i32
  }
  func.func @transform_4(%arg0: i32, %arg1: i32) -> (i32, i32) {
    %c0_i32 = arith.constant 0 : i32
    %c0_i32_0 = arith.constant 0 : i32
    %c0_i32_1 = arith.constant 0 : i32
    return %c0_i32, %c0_i32_0 : i32, i32
  }
  func.func @transform_5(%arg0: i32, %arg1: i32) -> (i32, i32) {
    %c0_i32 = arith.constant 0 : i32
    %c0_i32_0 = arith.constant 0 : i32
    return %arg0, %c0_i32 : i32, i32
  }
}

module attributes {stable_mosaic.version = 11 : i64} {
  func.func @_linear_kernel(%arg0: i32, %arg1: i32, %arg2: i32, %arg3: memref<8x128xbf16, #tpu.memory_space<vmem>>, %arg4: memref<128x128xbf16, #tpu.memory_space<vmem>>, %arg5: memref<1x128xf32, #tpu.memory_space<vmem>>, %arg6: memref<8x128xf32, #tpu.memory_space<vmem>>, %arg7: memref<8x128xf32, #tpu.memory_space<vmem>>) attributes {dimension_semantics = [#tpu.dimension_semantics<parallel>, #tpu.dimension_semantics<parallel>, #tpu.dimension_semantics<arbitrary>], iteration_bounds = array<i64: 1, 1, 1>, scalar_prefetch = 0 : i64, scratch_operands = 1 : i64, tpu.core_type = #tpu.core_type<tc>, window_params = [{transform_indices = @transform_0, window_bounds = array<i64: 8, 128>}, {transform_indices = @transform_1, window_bounds = array<i64: 128, 128>}, {transform_indices = @transform_2, window_bounds = array<i64: 1, 128>}, {transform_indices = @transform_3, window_bounds = array<i64: 8, 128>}]} {
    %c0_i32 = arith.constant 0 : i32
    %0 = arith.cmpi eq, %arg2, %c0_i32 : i32
    %1 = arith.extui %0 : i1 to i32
    %c0_i32_0 = arith.constant 0 : i32
    %2 = arith.cmpi ne, %1, %c0_i32_0 : i32
    scf.if %2 {
      %cst_10 = arith.constant 0.000000e+00 : f32
      %12 = vector.broadcast %cst_10 : f32 to vector<8x128xf32>
      %c0_11 = arith.constant 0 : index
      %c0_12 = arith.constant 0 : index
      %13 = vector.load %arg7[%c0_11, %c0_12] : memref<8x128xf32, #tpu.memory_space<vmem>>, vector<8x128xf32>
      tpu.vector_store %arg7[%c0_11, %c0_12], %12 {strides = array<i32>} : memref<8x128xf32, #tpu.memory_space<vmem>>, vector<8x128xf32>,
    } else {
    }
    %c0 = arith.constant 0 : index
    %c0_1 = arith.constant 0 : index
    %3 = vector.load %arg7[%c0, %c0_1] : memref<8x128xf32, #tpu.memory_space<vmem>>, vector<8x128xf32>
    %c0_2 = arith.constant 0 : index
    %c0_3 = arith.constant 0 : index
    %4 = vector.load %arg3[%c0_2, %c0_3] : memref<8x128xbf16, #tpu.memory_space<vmem>>, vector<8x128xbf16>
    %c0_4 = arith.constant 0 : index
    %c0_5 = arith.constant 0 : index
    %5 = vector.load %arg4[%c0_4, %c0_5] : memref<128x128xbf16, #tpu.memory_space<vmem>>, vector<128x128xbf16>
    %cst = arith.constant dense<0.000000e+00> : vector<8x128xf32>
    %6 = tpu.matmul %4, %5, %cst {dimension_numbers = #tpu.dot_dimension_numbers<[1], [0], [0], [1], [0, 0, 1, 1], [], []>} : vector<8x128xbf16>, vector<128x128xbf16>, vector<8x128xf32> -> vector<8x128xf32>
    %7 = arith.addf %3, %6 : vector<8x128xf32>
    %c0_6 = arith.constant 0 : index
    %c0_7 = arith.constant 0 : index
    %8 = vector.load %arg7[%c0_6, %c0_7] : memref<8x128xf32, #tpu.memory_space<vmem>>, vector<8x128xf32>
    tpu.vector_store %arg7[%c0_6, %c0_7], %7 {strides = array<i32>} : memref<8x128xf32, #tpu.memory_space<vmem>>, vector<8x128xf32>,
    %c0_i32_8 = arith.constant 0 : i32
    %9 = arith.cmpi eq, %arg2, %c0_i32_8 : i32
    %10 = arith.extui %9 : i1 to i32
    %c0_i32_9 = arith.constant 0 : i32
    %11 = arith.cmpi ne, %10, %c0_i32_9 : i32
    scf.if %11 {
      %c0_10 = arith.constant 0 : index
      %c0_11 = arith.constant 0 : index
      %12 = vector.load %arg7[%c0_10, %c0_11] : memref<8x128xf32, #tpu.memory_space<vmem>>, vector<8x128xf32>
      %c0_12 = arith.constant 0 : index
      %c0_13 = arith.constant 0 : index
      %13 = vector.load %arg5[%c0_12, %c0_13] : memref<1x128xf32, #tpu.memory_space<vmem>>, vector<1x128xf32>
      %14 = vector.broadcast %13 : vector<1x128xf32> to vector<8x128xf32>
      %15 = arith.addf %12, %14 : vector<8x128xf32>
      %c0_14 = arith.constant 0 : index
      %c0_15 = arith.constant 0 : index
      %16 = vector.load %arg6[%c0_14, %c0_15] : memref<8x128xf32, #tpu.memory_space<vmem>>, vector<8x128xf32>
      tpu.vector_store %arg6[%c0_14, %c0_15], %15 {strides = array<i32>} : memref<8x128xf32, #tpu.memory_space<vmem>>, vector<8x128xf32>,
    } else {
    }
    return
  }
  func.func @transform_0(%arg0: i32, %arg1: i32, %arg2: i32) -> (i32, i32) {
    %c0_i32 = arith.constant 0 : i32
    return %arg0, %arg2 : i32, i32
  }
  func.func @transform_1(%arg0: i32, %arg1: i32, %arg2: i32) -> (i32, i32) {
    %c0_i32 = arith.constant 0 : i32
    return %arg2, %arg1 : i32, i32
  }
  func.func @transform_2(%arg0: i32, %arg1: i32, %arg2: i32) -> (i32, i32) {
    %c0_i32 = arith.constant 0 : i32
    %c0_i32_0 = arith.constant 0 : i32
    return %c0_i32, %arg1 : i32, i32
  }
  func.func @transform_3(%arg0: i32, %arg1: i32, %arg2: i32) -> (i32, i32) {
    %c0_i32 = arith.constant 0 : i32
    return %arg0, %arg1 : i32, i32
  }
}

module attributes {stable_mosaic.version = 11 : i64} {
  func.func @_linear_kernel(%arg0: i32, %arg1: i32, %arg2: i32, %arg3: memref<8x128xbf16, #tpu.memory_space<vmem>>, %arg4: memref<128x128xbf16, #tpu.memory_space<vmem>>, %arg5: memref<1x128xf32, #tpu.memory_space<vmem>>, %arg6: memref<8x128xf32, #tpu.memory_space<vmem>>, %arg7: memref<8x128xf32, #tpu.memory_space<vmem>>) attributes {dimension_semantics = [#tpu.dimension_semantics<parallel>, #tpu.dimension_semantics<parallel>, #tpu.dimension_semantics<arbitrary>], iteration_bounds = array<i64: 1, 1, 1>, scalar_prefetch = 0 : i64, scratch_operands = 1 : i64, tpu.core_type = #tpu.core_type<tc>, window_params = [{transform_indices = @transform_0, window_bounds = array<i64: 8, 128>}, {transform_indices = @transform_1, window_bounds = array<i64: 128, 128>}, {transform_indices = @transform_2, window_bounds = array<i64: 1, 128>}, {transform_indices = @transform_3, window_bounds = array<i64: 8, 128>}]} {
    %c0_i32 = arith.constant 0 : i32
    %0 = arith.cmpi eq, %arg2, %c0_i32 : i32
    %1 = arith.extui %0 : i1 to i32
    %c0_i32_0 = arith.constant 0 : i32
    %2 = arith.cmpi ne, %1, %c0_i32_0 : i32
    scf.if %2 {
      %cst_10 = arith.constant 0.000000e+00 : f32
      %12 = vector.broadcast %cst_10 : f32 to vector<8x128xf32>
      %c0_11 = arith.constant 0 : index
      %c0_12 = arith.constant 0 : index
      %13 = vector.load %arg7[%c0_11, %c0_12] : memref<8x128xf32, #tpu.memory_space<vmem>>, vector<8x128xf32>
      tpu.vector_store %arg7[%c0_11, %c0_12], %12 {strides = array<i32>} : memref<8x128xf32, #tpu.memory_space<vmem>>, vector<8x128xf32>,
    } else {
    }
    %c0 = arith.constant 0 : index
    %c0_1 = arith.constant 0 : index
    %3 = vector.load %arg7[%c0, %c0_1] : memref<8x128xf32, #tpu.memory_space<vmem>>, vector<8x128xf32>
    %c0_2 = arith.constant 0 : index
    %c0_3 = arith.constant 0 : index
    %4 = vector.load %arg3[%c0_2, %c0_3] : memref<8x128xbf16, #tpu.memory_space<vmem>>, vector<8x128xbf16>
    %c0_4 = arith.constant 0 : index
    %c0_5 = arith.constant 0 : index
    %5 = vector.load %arg4[%c0_4, %c0_5] : memref<128x128xbf16, #tpu.memory_space<vmem>>, vector<128x128xbf16>
    %cst = arith.constant dense<0.000000e+00> : vector<8x128xf32>
    %6 = tpu.matmul %4, %5, %cst {dimension_numbers = #tpu.dot_dimension_numbers<[1], [0], [0], [1], [0, 0, 1, 1], [], []>} : vector<8x128xbf16>, vector<128x128xbf16>, vector<8x128xf32> -> vector<8x128xf32>
    %7 = arith.addf %3, %6 : vector<8x128xf32>
    %c0_6 = arith.constant 0 : index
    %c0_7 = arith.constant 0 : index
    %8 = vector.load %arg7[%c0_6, %c0_7] : memref<8x128xf32, #tpu.memory_space<vmem>>, vector<8x128xf32>
    tpu.vector_store %arg7[%c0_6, %c0_7], %7 {strides = array<i32>} : memref<8x128xf32, #tpu.memory_space<vmem>>, vector<8x128xf32>,
    %c0_i32_8 = arith.constant 0 : i32
    %9 = arith.cmpi eq, %arg2, %c0_i32_8 : i32
    %10 = arith.extui %9 : i1 to i32
    %c0_i32_9 = arith.constant 0 : i32
    %11 = arith.cmpi ne, %10, %c0_i32_9 : i32
    scf.if %11 {
      %c0_10 = arith.constant 0 : index
      %c0_11 = arith.constant 0 : index
      %12 = vector.load %arg7[%c0_10, %c0_11] : memref<8x128xf32, #tpu.memory_space<vmem>>, vector<8x128xf32>
      %c0_12 = arith.constant 0 : index
      %c0_13 = arith.constant 0 : index
      %13 = vector.load %arg5[%c0_12, %c0_13] : memref<1x128xf32, #tpu.memory_space<vmem>>, vector<1x128xf32>
      %14 = vector.broadcast %13 : vector<1x128xf32> to vector<8x128xf32>
      %15 = arith.addf %12, %14 : vector<8x128xf32>
      %16 = math.tanh %15 : vector<8x128xf32>
      %c0_14 = arith.constant 0 : index
      %c0_15 = arith.constant 0 : index
      %17 = vector.load %arg6[%c0_14, %c0_15] : memref<8x128xf32, #tpu.memory_space<vmem>>, vector<8x128xf32>
      tpu.vector_store %arg6[%c0_14, %c0_15], %16 {strides = array<i32>} : memref<8x128xf32, #tpu.memory_space<vmem>>, vector<8x128xf32>,
    } else {
    }
    return
  }
  func.func @transform_0(%arg0: i32, %arg1: i32, %arg2: i32) -> (i32, i32) {
    %c0_i32 = arith.constant 0 : i32
    return %arg0, %arg2 : i32, i32
  }
  func.func @transform_1(%arg0: i32, %arg1: i32, %arg2: i32) -> (i32, i32) {
    %c0_i32 = arith.constant 0 : i32
    return %arg2, %arg1 : i32, i32
  }
  func.func @transform_2(%arg0: i32, %arg1: i32, %arg2: i32) -> (i32, i32) {
    %c0_i32 = arith.constant 0 : i32
    %c0_i32_0 = arith.constant 0 : i32
    return %c0_i32, %arg1 : i32, i32
  }
  func.func @transform_3(%arg0: i32, %arg1: i32, %arg2: i32) -> (i32, i32) {
    %c0_i32 = arith.constant 0 : i32
    return %arg0, %arg1 : i32, i32
  }
}

</mosaic_0001>

<bundles_post_ra>
// kernel: bert_forward.11
= control target key start
LH: loop header
LB: loop body
LE: loop exit
PB: predicated region body
PF: predicated region fallthrough
CT: control target
= control target key end

     0   :  { %v396_v36 = vmov 128.0   ;;  %s507_s1 = inlined_call_operand.vmem [shape: bf16[256,128], index: 1, kind: input, shape index: {}]   ;;  %s508_s0 = inlined_call_operand.vmem [shape: bf16[16,256], index: 0, kind: input, shape index: {}]   ;;  %s509_s2 = inlined_call_operand.vmem [shape: f32[1,128], index: 2, kind: input, shape index: {}]   ;;  %s510_s3 = inlined_call_operand.vmem [shape: bf16[16,128], index: 3, kind: input, shape index: {}]   ;;  %s511_s4 = inlined_call_operand.vmem [shape: f32[1,128], index: 4, kind: input, shape index: {}]   ;;  %s512_s5 = inlined_call_operand.vmem [shape: f32[1,128], index: 5, kind: input, shape index: {}]   ;;  %s513_s6 = inlined_call_operand.vmem [shape: bf16[16,128], index: 6, kind: output, shape index: {}]  }
   0x1   :  { %v368_v0 = vld [vmem:[%s507_s1 + $0x38] sm:$0xff]  ;;  %v367_v2 = vld [vmem:[%s507_s1 + $0x30] sm:$0xff]  ;;  %v366_v4 = vld [vmem:[%s507_s1 + $0x28] sm:$0xff]  ;;  %390 = vrcp.f32 %v396_v36 }
   0x2   :  { %v376_v1 = vld [vmem:[%s507_s1 + $0x78] sm:$0xff]  ;;  %171 = vmatpush.bf16.msra.mxu0 %v368_v0  ;;  %v375_v3 = vld [vmem:[%s507_s1 + $0x70] sm:$0xff]  ;;  %v374_v5 = vld [vmem:[%s507_s1 + $0x68] sm:$0xff] }
   0x3   :  { %185 = vmatpush.bf16.msra.mxu1 %v376_v1  ;;  %v365_v6 = vld [vmem:[%s507_s1 + $0x20] sm:$0xff]  ;;  %v364_v8 = vld [vmem:[%s507_s1 + $0x18] sm:$0xff]  ;;  %v363_v10 = vld [vmem:[%s507_s1 + $0x10] sm:$0xff] }
   0x4   :  { %v373_v7 = vld [vmem:[%s507_s1 + $0x60] sm:$0xff]  ;;  %v372_v9 = vld [vmem:[%s507_s1 + $0x58] sm:$0xff]  ;;  %v371_v11 = vld [vmem:[%s507_s1 + $0x50] sm:$0xff] }
   0x5   :  { %v362_v12 = vld [vmem:[%s507_s1 + $0x8] sm:$0xff]  ;;  %v361_v14 = vld [vmem:[%s507_s1] sm:$0xff] }
   0x6   :  { %172 = vmatpush.bf16.msra.mxu0 %v367_v2  ;;  %v370_v13 = vld [vmem:[%s507_s1 + $0x48] sm:$0xff]  ;;  %v369_v15 = vld [vmem:[%s507_s1 + $0x40] sm:$0xff] }
   0x7   :  { %186 = vmatpush.bf16.msra.mxu1 %v375_v3  ;;  %v289_v16 = vld [vmem:[%s508_s0] sm:$0xf]  ;;  %v360_v17 = vld [vmem:[%s508_s0 + $0x4] sm:$0xf0]  ;;  %v359_v18 = vld [vmem:[%s508_s0 + $0x4] sm:$0xf]  ;;  %v391_v37 = vpop.eup %390 }
   0x8   :  { %v291_v19 = vld [vmem:[%s508_s0 + $0x8] sm:$0xf0]  ;;  %v290_v20 = vor.u32 %v360_v17, %v289_v16  ;;  %v378_v22 = vld [vmem:[%s510_s3] sm:$0xff]   ;;  %v225_v38 = vmul.f32 128.0, %v391_v37  ;;  %vm229_vm0 = vweird.f32 %v391_v37 }
   0x9   :  { %v294_v21 = vor.u32 %v359_v18, %v291_v19  ;;  %v387_v23 = vld [vmem:[%s509_s2] ss:$0 sm:$0xff]  ;;  %v379_v27 = vunpack.c.l.bf16 %v378_v22  ;;  %v380_v33 = vunpack.c.h.bf16 %v378_v22 }
   0xa   :  { %173 = vmatpush.bf16.msra.mxu0 %v366_v4  ;;  %v226_v39 = vsub.f32 1.0, %v225_v38 }
   0xb   :  { %187 = vmatpush.bf16.msra.mxu1 %v374_v5  ;;  %v388_v5 = vld [vmem:[%s511_s4] ss:$0 sm:$0xff] }
   0xc   :  { %v227_v40 = vmul.f32 %v391_v37, %v226_v39 }
   0xe   :  { %174 = vmatpush.bf16.msra.mxu0 %v365_v6  ;;  %v228_v41 = vadd.f32 %v391_v37, %v227_v40 }
   0xf   :  { %188 = vmatpush.bf16.msra.mxu1 %v373_v7 }
  0x10   :  { %v230_v42 = vsel %vm229_vm0, %v391_v37, %v228_v41 }
  0x12   :  { %175 = vmatpush.bf16.msra.mxu0 %v364_v8 }
  0x13   :  { %189 = vmatpush.bf16.msra.mxu1 %v372_v9  ;;  %v389_v9 = vld [vmem:[%s512_s5] ss:$0 sm:$0xff] }
  0x16   :  { %176 = vmatpush.bf16.msra.mxu0 %v363_v10 }
  0x17   :  { %190 = vmatpush.bf16.msra.mxu1 %v371_v11 }
  0x1a   :  { %177 = vmatpush.bf16.msra.mxu0 %v362_v12 }
  0x1b   :  { %191 = vmatpush.bf16.msra.mxu1 %v370_v13 }
  0x1e   :  { %178 = vmatpush.bf16.msra.mxu0 %v361_v14 }
  0x1f   :  { %192 = vmatpush.bf16.msra.mxu1 %v369_v15 }
  0x21   :  { %179 = vmatmul.bf16.vlgmr.msra.gmra.mxu0 %v290_v20 }
  0x22   :  { %193 = vmatmul.bf16.vlgmr.msra.gmra.mxu1 %v294_v21 }
  0x9e   :  { %v180_v24 = vpop.f32.mrf.mxu0 }
  0x9f   :  { %v194_v25 = vpop.f32.mrf.mxu1 }
  0xa0   :  { %v195_v26 = vadd.f32 %v194_v25, %v180_v24 }
  0xa2   :  { %v212_v28 = vadd.f32 %v387_v23, %v195_v26 }
  0xa4   :  { %v218_v29 = vadd.f32 %v379_v27, %v212_v28 }
  0xa6   :  { %220 = vadd.xlane.f32.xlu0 %v218_v29  ;;  %v182_v30 = vpop.f32.mrf.mxu0 }
  0xa7   :  { %v196_v31 = vpop.f32.mrf.mxu1 }
  0xa8   :  { %v197_v32 = vadd.f32 %v196_v31, %v182_v30 }
  0xaa   :  { %v213_v34 = vadd.f32 %v387_v23, %v197_v32 }
  0xac   :  { %v219_v35 = vadd.f32 %v380_v33, %v213_v34 }
  0xae   :  { %222 = vadd.xlane.f32.xlu0 %v219_v35 }
 0x119   :  { %v221_v43 = vpop.xlane.xlu0 %220 }
 0x11a   :  { %v231_v44 = vmul.f32 %v230_v42, %v221_v43 }
 0x11c   :  { %v233_v45 = vsub.f32 %v218_v29, %v231_v44 }
 0x11e   :  { %v235_v46 = vmul.f32 %v233_v45, %v233_v45 }
 0x120   :  { %237 = vadd.xlane.f32.xlu1 %v235_v46 }
 0x121   :  { %v223_v47 = vpop.xlane.xlu0 %222 }
 0x122   :  { %v232_v48 = vmul.f32 %v230_v42, %v223_v47 }
 0x124   :  { %v234_v49 = vsub.f32 %v219_v35, %v232_v48 }
 0x126   :  { %v236_v50 = vmul.f32 %v234_v49, %v234_v49 }
 0x128   :  { %239 = vadd.xlane.f32.xlu1 %v236_v50 }
 0x193   :  { %v238_v51 = vpop.xlane.xlu1 %237 }
 0x194   :  { %v241_v52 = vmul.f32 %v238_v51, %v230_v42 }
 0x196   :  { %v243_v53 = vadd.f32 1e-05, %v241_v52 }
 0x198   :  { %392 = vrsqrt.f32 %v243_v53  ;;  %vm251_vm2 = vweird.f32 %v243_v53 }
 0x19b   :  { %v240_v54 = vpop.xlane.xlu1 %239 }
 0x19c   :  { %v242_v55 = vmul.f32 %v240_v54, %v230_v42 }
 0x19e   :  { %v393_v56 = vpop.eup %392  ;;  %v244_v57 = vadd.f32 1e-05, %v242_v55 }
 0x19f   :  { %v246_v58 = vmul.f32 %v393_v56, %v243_v53  ;;  %vm252_vm1 = vweird.f32 %v393_v56 }
 0x1a0   :  { %394 = vrsqrt.f32 %v244_v57  ;;  %vm253_vm3 = vmor %vm251_vm2, %vm252_vm1  ;;  %vm261_vm5 = vweird.f32 %v244_v57 }
 0x1a1   :  { %v247_v59 = vmul.f32 %v393_v56, %v246_v58 }
 0x1a3   :  { %v248_v60 = vmul.f32 0.5, %v247_v59 }
 0x1a5   :  { %v249_v61 = vsub.f32 1.5, %v248_v60 }
 0x1a6   :  { %v395_v62 = vpop.eup %394 }
 0x1a7   :  { %v250_v63 = vmul.f32 %v393_v56, %v249_v61  ;;  %v256_v0 = vmul.f32 %v395_v62, %v244_v57  ;;  %vm262_vm4 = vweird.f32 %v395_v62 }
 0x1a8   :  { %vm263_vm6 = vmor %vm261_vm5, %vm262_vm4 }
 0x1a9   :  { %v257_v1 = vmul.f32 %v395_v62, %v256_v0  ;;  %v254_v2 = vsel %vm253_vm3, %v393_v56, %v250_v63 }
 0x1aa   :  { %v265_v6 = vmul.f32 %v254_v2, %v233_v45 }
 0x1ab   :  { %v258_v3 = vmul.f32 0.5, %v257_v1 }
 0x1ac   :  { %v271_v10 = vmul.f32 %v388_v5, %v265_v6 }
 0x1ad   :  { %v259_v4 = vsub.f32 1.5, %v258_v3 }
 0x1ae   :  { %v277_v13 = vadd.f32 %v389_v9, %v271_v10 }
 0x1af   :  { %v260_v7 = vmul.f32 %v395_v62, %v259_v4 }
 0x1b1   :  { %v264_v8 = vsel %vm263_vm6, %v395_v62, %v260_v7 }
 0x1b2   :  { %v266_v11 = vmul.f32 %v264_v8, %v234_v49 }
 0x1b4   :  { %v272_v12 = vmul.f32 %v388_v5, %v266_v11 }
 0x1b6   :  { %v278_v14 = vadd.f32 %v389_v9, %v272_v12 }
 0x1b8   :  { %v384_v15 = vpack.c.bf16 %v278_v14, %v277_v13 }
 0x1ba   :  { %385 = vst [vmem:[%s513_s6] sm:$0xff] %v384_v15  }

// kernel: bert_forward.10
= control target key start
LH: loop header
LB: loop body
LE: loop exit
PB: predicated region body
PF: predicated region fallthrough
CT: control target
= control target key end

     0   :  { %s408_s1 = inlined_call_operand.vmem [shape: bf16[128,256], index: 1, kind: input, shape index: {}]   ;;  %s409_s0 = inlined_call_operand.vmem [shape: bf16[16,128], index: 0, kind: input, shape index: {}]   ;;  %s410_s2 = inlined_call_operand.vmem [shape: f32[1,256], index: 2, kind: input, shape index: {}]   ;;  %s411_s3 = inlined_call_operand.vmem [shape: bf16[16,256], index: 3, kind: output, shape index: {}]  }
   0x1   :  { %v257_v0 = vld [vmem:[%s408_s1 + $0x70] sm:$0xf]  ;;  %v279_v1 = vld [vmem:[%s408_s1 + $0x74] sm:$0xf0]  ;;  %v278_v2 = vld [vmem:[%s408_s1 + $0x74] sm:$0xf] }
   0x2   :  { %v258_v3 = vor.u32 %v279_v1, %v257_v0  ;;  %v259_v4 = vld [vmem:[%s408_s1 + $0x78] sm:$0xf0]  ;;  %v249_v5 = vld [vmem:[%s408_s1 + $0x60] sm:$0xf]  ;;  %v277_v6 = vld [vmem:[%s408_s1 + $0x64] sm:$0xf0] }
   0x3   :  { %v262_v7 = vor.u32 %v278_v2, %v259_v4  ;;  %v276_v8 = vld [vmem:[%s408_s1 + $0x64] sm:$0xf]  ;;  %v251_v9 = vld [vmem:[%s408_s1 + $0x68] sm:$0xf0]  ;;  %v250_v10 = vor.u32 %v277_v6, %v249_v5  ;;  %v241_v12 = vld [vmem:[%s408_s1 + $0x50] sm:$0xf] }
   0x4   :  { %130 = vmatpush.bf16.msra.mxu0 %v258_v3  ;;  %v254_v11 = vor.u32 %v276_v8, %v251_v9  ;;  %v275_v13 = vld [vmem:[%s408_s1 + $0x54] sm:$0xf0]  ;;  %v274_v14 = vld [vmem:[%s408_s1 + $0x54] sm:$0xf]  ;;  %v243_v15 = vld [vmem:[%s408_s1 + $0x58] sm:$0xf0] }
   0x5   :  { %144 = vmatpush.bf16.msra.mxu1 %v262_v7  ;;  %v242_v16 = vor.u32 %v275_v13, %v241_v12  ;;  %v246_v17 = vor.u32 %v274_v14, %v243_v15  ;;  %v233_v18 = vld [vmem:[%s408_s1 + $0x40] sm:$0xf]  ;;  %v273_v19 = vld [vmem:[%s408_s1 + $0x44] sm:$0xf0]  ;;  %v272_v20 = vld [vmem:[%s408_s1 + $0x44] sm:$0xf] }
   0x6   :  { %v235_v21 = vld [vmem:[%s408_s1 + $0x48] sm:$0xf0]  ;;  %v234_v22 = vor.u32 %v273_v19, %v233_v18  ;;  %v225_v24 = vld [vmem:[%s408_s1 + $0x30] sm:$0xf]  ;;  %v271_v25 = vld [vmem:[%s408_s1 + $0x34] sm:$0xf0] }
   0x7   :  { %v238_v23 = vor.u32 %v272_v20, %v235_v21  ;;  %v270_v26 = vld [vmem:[%s408_s1 + $0x34] sm:$0xf]  ;;  %v227_v27 = vld [vmem:[%s408_s1 + $0x38] sm:$0xf0]  ;;  %v226_v28 = vor.u32 %v271_v25, %v225_v24  ;;  %v217_v30 = vld [vmem:[%s408_s1 + $0x20] sm:$0xf] }
   0x8   :  { %131 = vmatpush.bf16.msra.mxu0 %v250_v10  ;;  %v230_v29 = vor.u32 %v270_v26, %v227_v27  ;;  %v269_v31 = vld [vmem:[%s408_s1 + $0x24] sm:$0xf0]  ;;  %v268_v32 = vld [vmem:[%s408_s1 + $0x24] sm:$0xf]  ;;  %v219_v33 = vld [vmem:[%s408_s1 + $0x28] sm:$0xf0] }
   0x9   :  { %145 = vmatpush.bf16.msra.mxu1 %v254_v11  ;;  %v218_v34 = vor.u32 %v269_v31, %v217_v30  ;;  %v222_v35 = vor.u32 %v268_v32, %v219_v33  ;;  %v209_v36 = vld [vmem:[%s408_s1 + $0x10] sm:$0xf]  ;;  %v267_v37 = vld [vmem:[%s408_s1 + $0x14] sm:$0xf0]  ;;  %v266_v38 = vld [vmem:[%s408_s1 + $0x14] sm:$0xf] }
   0xa   :  { %v211_v39 = vld [vmem:[%s408_s1 + $0x18] sm:$0xf0]  ;;  %v210_v40 = vor.u32 %v267_v37, %v209_v36  ;;  %v201_v42 = vld [vmem:[%s408_s1] sm:$0xf]  ;;  %v265_v43 = vld [vmem:[%s408_s1 + $0x4] sm:$0xf0] }
   0xb   :  { %v214_v41 = vor.u32 %v266_v38, %v211_v39  ;;  %v264_v44 = vld [vmem:[%s408_s1 + $0x4] sm:$0xf]  ;;  %v203_v45 = vld [vmem:[%s408_s1 + $0x8] sm:$0xf0]  ;;  %v202_v46 = vor.u32 %v265_v43, %v201_v42  ;;  %v173_v49 = vld [vmem:[%s410_s2] sm:$0x3] }
   0xc   :  { %132 = vmatpush.bf16.msra.mxu0 %v242_v16  ;;  %v206_v47 = vor.u32 %v264_v44, %v203_v45  ;;  %v263_v48 = vld [vmem:[%s409_s0] sm:$0xff]  ;;  %v175_v50 = vperm.slane %v173_v49, 0  ;;  %v176_v51 = vperm.slane %v173_v49, 1 }
   0xd   :  { %146 = vmatpush.bf16.msra.mxu1 %v246_v17 }
  0x10   :  { %133 = vmatpush.bf16.msra.mxu0 %v234_v22 }
  0x11   :  { %147 = vmatpush.bf16.msra.mxu1 %v238_v23 }
  0x14   :  { %134 = vmatpush.bf16.msra.mxu0 %v226_v28 }
  0x15   :  { %148 = vmatpush.bf16.msra.mxu1 %v230_v29 }
  0x18   :  { %135 = vmatpush.bf16.msra.mxu0 %v218_v34 }
  0x19   :  { %149 = vmatpush.bf16.msra.mxu1 %v222_v35 }
  0x1c   :  { %136 = vmatpush.bf16.msra.mxu0 %v210_v40 }
  0x1d   :  { %150 = vmatpush.bf16.msra.mxu1 %v214_v41 }
  0x20   :  { %137 = vmatpush.bf16.msra.mxu0 %v202_v46 }
  0x21   :  { %151 = vmatpush.bf16.msra.mxu1 %v206_v47 }
  0x23   :  { %138 = vmatmul.bf16.vlgmr.msra.gmra.mxu0 %v263_v48 }
  0x24   :  { %152 = vmatmul.bf16.vlgmr.msra.gmra.mxu1 %v263_v48 }
  0xa0   :  { %v139_v52 = vpop.f32.mrf.mxu0 }
  0xa1   :  { %v179_v53 = vadd.f32 %v175_v50, %v139_v52  ;;  %v153_v54 = vpop.f32.mrf.mxu1 }
  0xa2   :  { %v180_v55 = vadd.f32 %v176_v51, %v153_v54 }
  0xa3   :  { %v183_v56 = vmax.f32 %v179_v53, 0.0 }
  0xa4   :  { %v184_v57 = vmax.f32 %v180_v55, 0.0 }
  0xa6   :  { %v187_v58 = vpack.c.bf16 %v184_v57, %v183_v56 }
  0xa8   :  { %189 = vst [vmem:[%s411_s3] sm:$0xff] %v187_v58  ;;  %v141_v59 = vpop.f32.mrf.mxu0 }
  0xa9   :  { %v181_v60 = vadd.f32 %v175_v50, %v141_v59  ;;  %v155_v61 = vpop.f32.mrf.mxu1 }
  0xaa   :  { %v182_v62 = vadd.f32 %v176_v51, %v155_v61 }
  0xab   :  { %v185_v63 = vmax.f32 %v181_v60, 0.0 }
  0xac   :  { %v186_v0 = vmax.f32 %v182_v62, 0.0 }
  0xae   :  { %v188_v1 = vpack.c.bf16 %v186_v0, %v185_v63 }
  0xb0   :  { %190 = vst [vmem:[%s411_s3 + $0x8] sm:$0xff] %v188_v1 }

// kernel: bert_forward.9
= control target key start
LH: loop header
LB: loop body
LE: loop exit
PB: predicated region body
PF: predicated region fallthrough
CT: control target
= control target key end

     0   :  { %s1198_s30 = smov [#allocation5]   ;;  %s1520_s0 = inlined_call_operand.vmem [shape: s32[2], index: 0, kind: input, shape index: {}]   ;;  %s1521_s1 = inlined_call_operand.vmem [shape: bf16[2,8,128], index: 1, kind: input, shape index: {}]   ;;  %s1522_s2 = inlined_call_operand.vmem [shape: bf16[128,384], index: 2, kind: input, shape index: {}]   ;;  %s1523_s3 = inlined_call_operand.vmem [shape: f32[1,384], index: 3, kind: input, shape index: {}]   ;;  %s1524_s4 = inlined_call_operand.vmem [shape: bf16[128,128], index: 4, kind: input, shape index: {}]   ;;  %s1525_s5 = inlined_call_operand.vmem [shape: f32[1,128], index: 5, kind: input, shape index: {}]   ;;  %s1526_s6 = inlined_call_operand.vmem [shape: f32[1,128], index: 6, kind: input, shape index: {}]   ;;  %s1527_s7 = inlined_call_operand.vmem [shape: f32[1,128], index: 7, kind: input, shape index: {}]   ;;  %s1528_s8 = inlined_call_operand.vmem [shape: bf16[2,8,128], index: 8, kind: output, shape index: {}]  }
   0x1   :  { %s14_s29 = sshll.u32 %s1520_s0, 4  ;;  %s15_s29 = int_to_ptr.vmem [resolvable:$true] %s14_s29 }
   0x2   :  { %17 = dma.vmem_to_smem %s15_s29, 16, %s1198_s30, [#allocation4] }
   0x3   :  { %1192 = dma.done.wait [#allocation4], 16 }
   0x4   :  { %1193 = vsyncadd [#allocation4], 4294967280 }
   0x5   :  { %20 = sfence }
   0x6   :  { %s1251_s9 = smov 0  }
   0x7 LB: > { %s1257_s10 = sadd.s32 4294967295, %s1196_s9   ;;  %p967_p0 = scmp.ge.s32.totalorder %s1196_s9, 1  ;;  %s1196_s9 = sphi %s1251_s9, %s26_s9  }
   0x8   : > { %p245_p1 = scmp.lt.s32.totalorder %s1196_s9, 3 }
   0xa   : > { %p246_p2 = pnand %p967_p0, %p245_p1 }
   0xb   : > { %p275_p3 = scmp.lt.s32.totalorder (!%p246_p2), %s1257_s10, 1  ;;  %s1199_s30 = smov (!%p246_p2), 64  }
   0xc   : > { %249 = sbr.rel (%p246_p2) target bundleno = 1672 (0x688), region = 48  ;;  %s1200_s0 = smov (!%p246_p2), 96  }
   0xd   : > { %s1201_s12 = smov (!%p246_p2), 32   ;;  %s284_s13 = sld [smem:[#allocation5 + %s1257_s10]] (!%p246_p2) }
  0x11   : > { %v1056_v0 = vld [vmem:[%s1522_s2 + $0xa8] sm:$0xf]  ;;  %v1130_v1 = vld [vmem:[%s1522_s2 + $0xb0] sm:$0xf0]  ;;  %v1129_v2 = vld [vmem:[%s1522_s2 + $0xac] sm:$0xf] }
  0x12   : > { %v1057_v3 = vor.u32 %v1130_v1, %v1056_v0  ;;  %v1058_v4 = vld [vmem:[%s1522_s2 + $0xb4] sm:$0xf0]  ;;  %v1044_v5 = vld [vmem:[%s1522_s2 + $0x90] sm:$0xf]  ;;  %v1127_v6 = vld [vmem:[%s1522_s2 + $0x98] sm:$0xf0] }
  0x13   : > { %v1061_v7 = vor.u32 %v1129_v2, %v1058_v4  ;;  %v1126_v8 = vld [vmem:[%s1522_s2 + $0x94] sm:$0xf]  ;;  %v1046_v9 = vld [vmem:[%s1522_s2 + $0x9c] sm:$0xf0]  ;;  %v1045_v10 = vor.u32 %v1127_v6, %v1044_v5  ;;  %v1032_v12 = vld [vmem:[%s1522_s2 + $0x78] sm:$0xf] }
  0x14   : > { %454 = vmatpush.bf16.msra.mxu0 %v1057_v3  ;;  %v1049_v11 = vor.u32 %v1126_v8, %v1046_v9  ;;  %v1124_v13 = vld [vmem:[%s1522_s2 + $0x80] sm:$0xf0]  ;;  %v1123_v14 = vld [vmem:[%s1522_s2 + $0x7c] sm:$0xf]  ;;  %v1034_v15 = vld [vmem:[%s1522_s2 + $0x84] sm:$0xf0] }
  0x15   : > { %467 = vmatpush.bf16.msra.mxu1 %v1061_v7  ;;  %v1033_v16 = vor.u32 %v1124_v13, %v1032_v12  ;;  %v1037_v17 = vor.u32 %v1123_v14, %v1034_v15  ;;  %v1020_v18 = vld [vmem:[%s1522_s2 + $0x60] sm:$0xf]  ;;  %v1121_v19 = vld [vmem:[%s1522_s2 + $0x68] sm:$0xf0]  ;;  %v1120_v20 = vld [vmem:[%s1522_s2 + $0x64] sm:$0xf] }
  0x16   : > { %v1022_v21 = vld [vmem:[%s1522_s2 + $0x6c] sm:$0xf0]  ;;  %v1021_v22 = vor.u32 %v1121_v19, %v1020_v18  ;;  %v1131_v24 = vld [vmem:[%s1522_s2 + $0xb8] sm:$0xf0]  ;;  %v1052_v25 = vld [vmem:[%s1522_s2 + $0x98] sm:$0xf] }
  0x17   : > { %v1064_v23 = vld [vmem:[%s1522_s2 + $0xb0] sm:$0xf]  ;;  %v1025_v26 = vor.u32 %v1120_v20, %v1022_v21  ;;  %v1008_v27 = vld [vmem:[%s1522_s2 + $0x48] sm:$0xf]  ;;  %v1118_v28 = vld [vmem:[%s1522_s2 + $0x50] sm:$0xf0] }
  0x18   : > { %455 = vmatpush.bf16.msra.mxu0 %v1045_v10  ;;  %v1065_v29 = vor.u32 %v1131_v24, %v1064_v23  ;;  %v1128_v30 = vld [vmem:[%s1522_s2 + $0xa0] sm:$0xf0]  ;;  %v1117_v31 = vld [vmem:[%s1522_s2 + $0x4c] sm:$0xf]  ;;  %v1010_v32 = vld [vmem:[%s1522_s2 + $0x54] sm:$0xf0]  ;;  %v1009_v34 = vor.u32 %v1118_v28, %v1008_v27 }
  0x19   : > { %468 = vmatpush.bf16.msra.mxu1 %v1049_v11  ;;  %v1053_v33 = vor.u32 %v1128_v30, %v1052_v25  ;;  %v1040_v35 = vld [vmem:[%s1522_s2 + $0x80] sm:$0xf]  ;;  %v1125_v36 = vld [vmem:[%s1522_s2 + $0x88] sm:$0xf0]  ;;  %v1013_v37 = vor.u32 %v1117_v31, %v1010_v32  ;;  %v996_v38 = vld [vmem:[%s1522_s2 + $0x30] sm:$0xf]  ;;  %v496_v31 = vlaneseq }
  0x1a   : > { %480 = vmatpush.bf16.msra.mxu2 %v1065_v29  ;;  %v1115_v39 = vld [vmem:[%s1522_s2 + $0x38] sm:$0xf0]  ;;  %v1114_v40 = vld [vmem:[%s1522_s2 + $0x34] sm:$0xf]  ;;  %v998_v41 = vld [vmem:[%s1522_s2 + $0x3c] sm:$0xf0]  ;;  %v1041_v42 = vor.u32 %v1125_v36, %v1040_v35 }
  0x1b   : > { %v997_v43 = vor.u32 %v1115_v39, %v996_v38  ;;  %v1028_v44 = vld [vmem:[%s1522_s2 + $0x68] sm:$0xf]  ;;  %v1122_v45 = vld [vmem:[%s1522_s2 + $0x70] sm:$0xf0]  ;;  %v1001_v46 = vor.u32 %v1114_v40, %v998_v41  ;;  %v984_v47 = vld [vmem:[%s1522_s2 + $0x18] sm:$0xf] }
  0x1c   : > { %456 = vmatpush.bf16.msra.mxu0 %v1033_v16  ;;  %v1112_v48 = vld [vmem:[%s1522_s2 + $0x20] sm:$0xf0]  ;;  %v1111_v49 = vld [vmem:[%s1522_s2 + $0x1c] sm:$0xf]  ;;  %v986_v50 = vld [vmem:[%s1522_s2 + $0x24] sm:$0xf0]  ;;  %v1029_v51 = vor.u32 %v1122_v45, %v1028_v44 }
  0x1d   : > { %469 = vmatpush.bf16.msra.mxu1 %v1037_v17  ;;  %s1371_s19 = scalar_select %p275_p3, %s1257_s10, 1  ;;  %v985_v52 = vor.u32 %v1112_v48, %v984_v47  ;;  %v1016_v53 = vld [vmem:[%s1522_s2 + $0x50] sm:$0xf]  ;;  %v1119_v54 = vld [vmem:[%s1522_s2 + $0x58] sm:$0xf0]  ;;  %v989_v55 = vor.u32 %v1111_v49, %v986_v50  ;;  %vm506_vm0 = vcmask 261120  }
  0x1e   : > { %481 = vmatpush.bf16.msra.mxu2 %v1053_v33  ;;  %v972_v56 = vld [vmem:[%s1522_s2] sm:$0xf]  ;;  %v1109_v57 = vld [vmem:[%s1522_s2 + $0x8] sm:$0xf0]  ;;  %v1108_v58 = vld [vmem:[%s1522_s2 + $0x4] sm:$0xf]  ;;  %v1017_v60 = vor.u32 %v1119_v54, %v1016_v53  ;;  %v498_v33 = vstv %s284_s13 }
  0x1f   : > { %v974_v59 = vld [vmem:[%s1522_s2 + $0xc] sm:$0xf0]  ;;  %s968_s11 = sshll.u32 %s1371_s19, 2  ;;  %v973_v61 = vor.u32 %v1109_v57, %v972_v56  ;;  %v1004_v62 = vld [vmem:[%s1522_s2 + $0x38] sm:$0xf]  ;;  %vm544_vm1 = vcmask 1043456  }
  0x20   : > { %457 = vmatpush.bf16.msra.mxu0 %v1021_v22  ;;  %v1116_v63 = vld [vmem:[%s1522_s2 + $0x40] sm:$0xf0]  ;;  %v977_v0 = vor.u32 %v1108_v58, %v974_v59  ;;  %s278_s18 = scalar_lea.vmem %s1521_s1, %s968_s11  ;;  %v992_v3 = vld [vmem:[%s1522_s2 + $0x20] sm:$0xf]  ;;  %v1113_v4 = vld [vmem:[%s1522_s2 + $0x28] sm:$0xf0]  ;;  %s282_s17 = scalar_lea.vmem %s1528_s8, %s968_s11 }
  0x21   : > { %470 = vmatpush.bf16.msra.mxu1 %v1025_v26  ;;  %v1005_v1 = vor.u32 %v1116_v63, %v1004_v62  ;;  %v1403_v2 = vld [vmem:[%s278_s18] sm:$0xf]  ;;  %v993_v5 = vor.u32 %v1113_v4, %v992_v3  ;;  %v980_v6 = vld [vmem:[%s1522_s2 + $0x8] sm:$0xf]  ;;  %v1110_v7 = vld [vmem:[%s1522_s2 + $0x10] sm:$0xf0] }
  0x22   : > { %482 = vmatpush.bf16.msra.mxu2 %v1041_v42  ;;  %v981_v8 = vor.u32 %v1110_v7, %v980_v6  ;;  %v318_v9 = vld [vmem:[%s1523_s3] sm:$0x7]  ;;  %v497_v32 = vand.u32 127, %v496_v31  ;;  %vm528_vm3 = vcmask 64512   ;;  %vm562_vm4 = vcmask 257024  }
  0x23   : > { %v321_v10 = vperm.slane %v318_v9, 1  ;;  %v320_v13 = vperm.slane %v318_v9, 0  ;;  %v322_v22 = vperm.slane %v318_v9, 2  ;;  %vm636_vm5 = vcmask 519424  }
  0x24   : > { %458 = vmatpush.bf16.msra.mxu0 %v1009_v34  ;;  %vm1437_vm2 = vcmp.lt.s32.totalorder %v497_v32, %v498_v33  ;;  %vm710_vm6 = vcmask 781824   ;;  %vm784_vm7 = vcmask 1044224  }
  0x25   : > { %471 = vmatpush.bf16.msra.mxu1 %v1013_v37 }
  0x26   : > { %483 = vmatpush.bf16.msra.mxu2 %v1029_v51 }
  0x28   : > { %459 = vmatpush.bf16.msra.mxu0 %v997_v43 }
  0x29   : > { %472 = vmatpush.bf16.msra.mxu1 %v1001_v46 }
  0x2a   : > { %484 = vmatpush.bf16.msra.mxu2 %v1017_v60 }
  0x2c   : > { %460 = vmatpush.bf16.msra.mxu0 %v985_v52 }
  0x2d   : > { %473 = vmatpush.bf16.msra.mxu1 %v989_v55 }
  0x2e   : > { %485 = vmatpush.bf16.msra.mxu2 %v1005_v1 }
  0x30   : > { %461 = vmatpush.bf16.msra.mxu0 %v973_v61 }
  0x31   : > { %474 = vmatpush.bf16.msra.mxu1 %v977_v0 }
  0x32   : > { %486 = vmatpush.bf16.msra.mxu2 %v993_v5 }
  0x33   : > { %462 = vmatmul.bf16.vlgmr.msra.gmra.mxu0 %v1403_v2 }
  0x34   : > { %475 = vmatmul.bf16.vlgmr.msra.gmra.mxu1 %v1403_v2 }
  0x36   : > { %487 = vmatpush.bf16.msra.mxu2 %v981_v8 }
  0x39   : > { %488 = vmatmul.bf16.vlgmr.msra.gmra.mxu2 %v1403_v2 }
  0xb0   : > { %v463_v11 = vpop.f32.mrf.mxu0 }
  0xb1   : > { %v476_v12 = vpop.f32.mrf.mxu1  ;;  %v464_v16 = vadd.f32 %v463_v11, %v320_v13 }
  0xb2   : > { %v477_v14 = vadd.f32 %v476_v12, %v321_v10 }
  0xb3   : > { %v501_v20 = vpack.c.bf16 %v464_v16, %v464_v16 }
  0xb4   : > { %v503_v15 = vpack.c.bf16 %v477_v14, %v477_v14 }
  0xb6   : > { %648 = vrot.lane.b32.xlu2 %v503_v15, %s1199_s30  ;;  %574 = vrot.lane.b32.xlu1 %v503_v15, %s1200_s0  ;;  %v511_v17 = vsel %vm506_vm0, %v503_v15, 0 }
  0xb7   : > { %520 = vmatpush.bf16.xpose.msra.mxu3 %v511_v17 }
  0xb8   : > { %v465_v18 = vpop.f32.mrf.mxu0 }
  0xb9   : > { %v478_v19 = vpop.f32.mrf.mxu1 }
  0xbc   : > { %v489_v21 = vpop.f32.mrf.mxu2 }
  0xbd   : > { %v490_v23 = vadd.f32 %v489_v21, %v322_v22 }
  0xbe   : > { %722 = vrot.lane.b32.xlu2 %v503_v15, %s1201_s12  ;;  %571 = vrot.lane.b32.xlu1 %v501_v20, %s1200_s0 }
  0xbf   : > { %1066 = vmatmul.msk.bf16.vlgmr.msra.gmra.mxu3 %vm506_vm0, %v501_v20  ;;  %v1430_v25 = vpack.c.bf16 %v490_v23, %v490_v23 }
  0xc1   : > { %v546_v26 = vsel %vm544_vm1, %v1430_v25, 0 }
  0xc2   : > { %555 = vmatpush.bf16.msrb.mxu3 %v546_v26 }
  0xc4   : > { %v491_v24 = vpop.f32.mrf.mxu2 }
  0xc6   : > { %719 = vrot.lane.b32.xlu1 %v501_v20, %s1201_s12 }
 0x110   : > { %v649_v27 = vpop.permute.xlu2 %648 }
 0x111   : > { %v654_v28 = vsel %vm506_vm0, %v649_v27, 0 }
 0x112   : > { %663 = vmatpush.bf16.xpose.msrb.mxu2 %v654_v28 }
 0x118   : > { %v723_v48 = vpop.permute.xlu2 %722 }
 0x119   : > { %v728_v50 = vsel %vm506_vm0, %v723_v48, 0 }
 0x128   : > { %v575_v29 = vpop.permute.xlu1 %574 }
 0x129   : > { %v580_v30 = vsel %vm506_vm0, %v575_v29, 0 }
 0x12a   : > { %589 = vmatpush.bf16.xpose.msra.mxu3 %v580_v30 }
 0x130   : > { %v572_v52 = vpop.permute.xlu1 %571 }
 0x138   : > { %v720_v53 = vpop.permute.xlu1 %719 }
 0x142   : > { %v522_v34 = vpop.f32.mrf.mxu3 }
 0x143   : > { %v526_v36 = vmul.f32 0.17677669, %v522_v34 }
 0x145   : > { %v527_v37 = vsel %vm1437_vm2, %v526_v36, -1000000.0 }
 0x146   : > { %v529_v38 = vsel %vm528_vm3, %v527_v37, -inf }
 0x147   : > { %530 = vmax.xlane.f32.xlu0 %v529_v38 }
 0x14a   : > { %v524_v39 = vpop.f32.mrf.mxu3 }
 0x1ba   : > { %v531_v40 = vpop.xlane.xlu0 %530 }
 0x1bb   : > { %v532_v41 = vsub.f32 %v527_v37, %v531_v40 }
 0x1bd   : > { %v533_v42 = vmul.f32 1.442695, %v532_v41 }
 0x1bf   : > { %1156 = vpow2.f32 %v533_v42 }
 0x1c5   : > { %v1157_v43 = vpop.eup %1156 }
 0x1c6   : > { %v535_v44 = vsel %vm528_vm3, %v1157_v43, 0.0 }
 0x1c7   : > { %536 = vadd.xlane.f32.xlu0 %v535_v44 }
 0x1db   : > { %645 = vrot.lane.b32.xlu0 %v501_v20, %s1199_s30 }
 0x23a   : > { %v537_v45 = vpop.xlane.xlu0 %536 }
 0x23b   : > { %1158 = vrcp.f32 %v537_v45 }
 0x241   : > { %v1159_v46 = vpop.eup %1158 }
 0x242   : > { %v539_v47 = vmul.f32 %v1159_v46, %v1157_v43 }
 0x244   : > { %v540_v49 = vpack.c.bf16 %v539_v47, %v539_v47 }
 0x246   : > { %1067 = vmatmul.msk.bf16.vlgmr.msrb.gmra.mxu3 %vm528_vm3, %v540_v49 }
 0x247   : > { %737 = vmatpush.bf16.xpose.msrb.mxu3 %v728_v50 }
 0x24d   : > { %v646_v51 = vpop.permute.xlu0 %645 }
 0x24e   : > { %1070 = vmatmul.msk.bf16.vlgmr.msrb.gmra.mxu2 %vm506_vm0, %v646_v51  ;;  %v1139_v51 = vld [vmem:[%s1524_s4 + $0x38] sm:$0xff] }
 0x24f   : > { %851 = vmatpush.bf16.msrb.mxu1 %v1139_v51 }
 0x256   : > { %1068 = vmatmul.msk.bf16.vlgmr.msra.gmra.mxu3 %vm506_vm0, %v572_v52  ;;  %v1138_v52 = vld [vmem:[%s1524_s4 + $0x30] sm:$0xff] }
 0x257   : > { %852 = vmatpush.bf16.msrb.mxu1 %v1138_v52 }
 0x266   : > { %1072 = vmatmul.msk.bf16.vlgmr.msrb.gmra.mxu3 %vm506_vm0, %v720_v53  ;;  %v1137_v53 = vld [vmem:[%s1524_s4 + $0x28] sm:$0xff] }
 0x267   : > { %853 = vmatpush.bf16.msrb.mxu1 %v1137_v53 }
 0x2c9   : > { %v557_v54 = vpop.f32.mrf.mxu3 }
 0x2ca   : > { %v561_v55 = vpack.c.bf16 %v557_v54, %v557_v54  ;;  %v1136_v54 = vld [vmem:[%s1524_s4 + $0x20] sm:$0xff] }
 0x2cb   : > { %854 = vmatpush.bf16.msrb.mxu1 %v1136_v54 }
 0x2cc   : > { %563 = vst.msk [vmem:[#allocation3] sm:$0xf] %vm562_vm4, %v561_v55  ;;  %v1135_v55 = vld [vmem:[%s1524_s4 + $0x18] sm:$0xff] }
 0x2cf   : > { %855 = vmatpush.bf16.msrb.mxu1 %v1135_v55 }
 0x2d1   : > { %v559_v56 = vpop.f32.mrf.mxu3  ;;  %v665_v57 = vpop.f32.mrf.mxu2 }
 0x2d2   : > { %v669_v58 = vmul.f32 0.17677669, %v665_v57  ;;  %v1134_v56 = vld [vmem:[%s1524_s4 + $0x10] sm:$0xff] }
 0x2d3   : > { %856 = vmatpush.bf16.msrb.mxu1 %v1134_v56 }
 0x2d4   : > { %v670_v59 = vsel %vm1437_vm2, %v669_v58, -1000000.0 }
 0x2d5   : > { %v671_v60 = vsel %vm528_vm3, %v670_v59, -inf }
 0x2d6   : > { %672 = vmax.xlane.f32.xlu1 %v671_v60  ;;  %v1132_v60 = vld [vmem:[%s1524_s4] sm:$0xff] }
 0x2d9   : > { %v591_v61 = vpop.f32.mrf.mxu3  ;;  %v667_v62 = vpop.f32.mrf.mxu2 }
 0x2da   : > { %v595_v63 = vmul.f32 0.17677669, %v591_v61 }
 0x2dc   : > { %v596_v0 = vsel %vm1437_vm2, %v595_v63, -1000000.0  ;;  %v864_v63 = vunpack.c.l.bf16 %v1403_v2 }
 0x2dd   : > { %v597_v1 = vsel %vm528_vm3, %v596_v0, -inf }
 0x2de   : > { %598 = vmax.xlane.f32.xlu2 %v597_v1 }
 0x2e1   : > { %v593_v3 = vpop.f32.mrf.mxu3 }
 0x2e9   : > { %v739_v4 = vpop.f32.mrf.mxu3 }
 0x2ea   : > { %v743_v5 = vmul.f32 0.17677669, %v739_v4 }
 0x2ec   : > { %v744_v6 = vsel %vm1437_vm2, %v743_v5, -1000000.0 }
 0x2ed   : > { %v745_v7 = vsel %vm528_vm3, %v744_v6, -inf }
 0x2ee   : > { %746 = vmax.xlane.f32.xlu0 %v745_v7 }
 0x2f1   : > { %v741_v8 = vpop.f32.mrf.mxu3 }
 0x302   : > { %684 = vrot.lane.b32.xlu0 %v1430_v25, %s1199_s30 }
 0x349   : > { %v673_v9 = vpop.xlane.xlu1 %672 }
 0x34a   : > { %v674_v10 = vsub.f32 %v670_v59, %v673_v9  ;;  %v1133_v59 = vld [vmem:[%s1524_s4 + $0x8] sm:$0xff] }
 0x34b   : > { %857 = vmatpush.bf16.msrb.mxu1 %v1133_v59 }
 0x34c   : > { %v675_v11 = vmul.f32 1.442695, %v674_v10 }
 0x34e   : > { %1160 = vpow2.f32 %v675_v11 }
 0x34f   : > { %858 = vmatpush.bf16.msrb.mxu1 %v1132_v60 }
 0x351   : > { %v599_v12 = vpop.xlane.xlu2 %598 }
 0x352   : > { %v600_v13 = vsub.f32 %v596_v0, %v599_v12  ;;  %v1153_v0 = vld [vmem:[%s1525_s5] ss:$0 sm:$0xff] }
 0x354   : > { %v1161_v14 = vpop.eup %1160  ;;  %v601_v15 = vmul.f32 1.442695, %v600_v13 }
 0x355   : > { %v677_v16 = vsel %vm528_vm3, %v1161_v14, 0.0 }
 0x356   : > { %1162 = vpow2.f32 %v601_v15  ;;  %678 = vadd.xlane.f32.xlu1 %v677_v16 }
 0x35c   : > { %v1163_v17 = vpop.eup %1162 }
 0x35d   : > { %v603_v18 = vsel %vm528_vm3, %v1163_v17, 0.0 }
 0x35e   : > { %604 = vadd.xlane.f32.xlu2 %v603_v18 }
 0x361   : > { %v747_v19 = vpop.xlane.xlu0 %746 }
 0x362   : > { %v748_v20 = vsub.f32 %v744_v6, %v747_v19  ;;  %v1202_v6 = vmov 128.0  }
 0x364   : > { %v749_v21 = vmul.f32 1.442695, %v748_v20 }
 0x366   : > { %1164 = vpow2.f32 %v749_v21 }
 0x36c   : > { %v1165_v22 = vpop.eup %1164 }
 0x36d   : > { %v751_v23 = vsel %vm528_vm3, %v1165_v22, 0.0 }
 0x36e   : > { %752 = vadd.xlane.f32.xlu1 %v751_v23 }
 0x374   : > { %v685_v24 = vpop.permute.xlu0 %684 }
 0x375   : > { %v690_v26 = vsel %vm544_vm1, %v685_v24, 0 }
 0x376   : > { %610 = vrot.lane.b32.xlu2 %v1430_v25, %s1200_s0  ;;  %699 = vmatpush.bf16.msra.mxu2 %v690_v26  ;;  %v1154_v26 = vld [vmem:[%s1526_s6] ss:$0 sm:$0xff] }
 0x387   : > { %758 = vrot.lane.b32.xlu1 %v1430_v25, %s1201_s12 }
 0x3c9   : > { %v679_v27 = vpop.xlane.xlu1 %678 }
 0x3ca   : > { %1166 = vrcp.f32 %v679_v27 }
 0x3d0   : > { %v1167_v28 = vpop.eup %1166 }
 0x3d1   : > { %v681_v29 = vmul.f32 %v1167_v28, %v1161_v14  ;;  %v605_v30 = vpop.xlane.xlu2 %604  ;;  %v1155_v28 = vld [vmem:[%s1527_s7] ss:$0 sm:$0xff] }
 0x3d2   : > { %1168 = vrcp.f32 %v605_v30 }
 0x3d3   : > { %v682_v31 = vpack.c.bf16 %v681_v29, %v681_v29 }
 0x3d5   : > { %1071 = vmatmul.msk.bf16.vlgmr.msra.gmra.mxu2 %vm528_vm3, %v682_v31 }
 0x3d8   : > { %v1169_v32 = vpop.eup %1168 }
 0x3d9   : > { %v607_v33 = vmul.f32 %v1169_v32, %v1163_v17  ;;  %v611_v34 = vpop.permute.xlu2 %610 }
 0x3da   : > { %v616_v35 = vsel %vm544_vm1, %v611_v34, 0 }
 0x3db   : > { %625 = vmatpush.bf16.msrb.mxu0 %v616_v35  ;;  %v608_v36 = vpack.c.bf16 %v607_v33, %v607_v33 }
 0x3de   : > { %1069 = vmatmul.msk.bf16.vlgmr.msrb.gmra.mxu0 %vm528_vm3, %v608_v36 }
 0x3e1   : > { %v753_v37 = vpop.xlane.xlu1 %752 }
 0x3e2   : > { %1170 = vrcp.f32 %v753_v37 }
 0x3e3   : > { %1172 = vrcp.f32 %v1202_v6 }
 0x3e8   : > { %v1171_v25 = vpop.eup %1170 }
 0x3e9   : > { %v755_v38 = vmul.f32 %v1171_v25, %v1165_v22  ;;  %v1173_v7 = vpop.eup %1172 }
 0x3ea   : > { %v874_v8 = vmul.f32 128.0, %v1173_v7  ;;  %vm878_vm8 = vweird.f32 %v1173_v7 }
 0x3eb   : > { %v756_v41 = vpack.c.bf16 %v755_v38, %v755_v38 }
 0x3ec   : > { %v875_v9 = vsub.f32 1.0, %v874_v8 }
 0x3ee   : > { %v876_v10 = vmul.f32 %v1173_v7, %v875_v9 }
 0x3f0   : > { %v877_v11 = vadd.f32 %v1173_v7, %v876_v10 }
 0x3f2   : > { %v879_v12 = vsel %vm878_vm8, %v1173_v7, %v877_v11 }
 0x3f9   : > { %v759_v39 = vpop.permute.xlu1 %758 }
 0x3fa   : > { %v764_v40 = vsel %vm544_vm1, %v759_v39, 0 }
 0x3fb   : > { %773 = vmatpush.bf16.msra.mxu0 %v764_v40 }
 0x3fe   : > { %1073 = vmatmul.msk.bf16.vlgmr.msra.gmra.mxu0 %vm528_vm3, %v756_v41 }
 0x458   : > { %v701_v42 = vpop.f32.mrf.mxu2 }
 0x459   : > { %v705_v47 = vpack.c.bf16 %v701_v42, %v701_v42 }
 0x45b   : > { %v627_v43 = vpop.f32.mrf.mxu0 }
 0x45c   : > { %v631_v44 = vpack.c.bf16 %v627_v43, %v627_v43 }
 0x45e   : > { %633 = vrot.lane.b32.xlu2 %v631_v44, %s1201_s12 }
 0x460   : > { %v703_v45 = vpop.f32.mrf.mxu2 }
 0x463   : > { %v629_v46 = vpop.f32.mrf.mxu0 }
 0x466   : > { %707 = vrot.lane.b32.xlu2 %v705_v47, %s1199_s30 }
 0x47b   : > { %v775_v48 = vpop.f32.mrf.mxu0 }
 0x47c   : > { %v779_v49 = vpack.c.bf16 %v775_v48, %v775_v48 }
 0x47e   : > { %781 = vrot.lane.b32.xlu0 %v779_v49, %s1200_s0 }
 0x483   : > { %v777_v50 = vpop.f32.mrf.mxu0 }
 0x4b8   : > { %v634_v57 = vpop.permute.xlu2 %633 }
 0x4b9   : > { %637 = vst.msk [vmem:[#allocation3] sm:$0xf] %vm636_vm5, %v634_v57 }
 0x4c0   : > { %v708_v58 = vpop.permute.xlu2 %707 }
 0x4c1   : > { %711 = vst.msk [vmem:[#allocation3] sm:$0xf] %vm710_vm6, %v708_v58 }
 0x4f0   : > { %v782_v61 = vpop.permute.xlu0 %781 }
 0x4f1   : > { %785 = vst.msk [vmem:[#allocation3] sm:$0xf] %vm784_vm7, %v782_v61 }
 0x4f8   : > { %v786_v62 = vld [vmem:[#allocation3] sm:$0xf] }
 0x4f9   : > { %859 = vmatmul.bf16.vlgmr.msrb.gmra.mxu1 %v786_v62 }
 0x576   : > { %v860_v1 = vpop.f32.mrf.mxu1 }
 0x577   : > { %v865_v3 = vadd.f32 %v864_v63, %v860_v1 }
 0x579   : > { %v870_v4 = vadd.f32 %v1153_v0, %v865_v3 }
 0x57b   : > { %871 = vadd.xlane.f32.xlu2 %v870_v4 }
 0x57e   : > { %v862_v5 = vpop.f32.mrf.mxu1 }
 0x5ee   : > { %v872_v13 = vpop.xlane.xlu2 %871 }
 0x5ef   : > { %v880_v2 = vmul.f32 %v879_v12, %v872_v13 }
 0x5f1   : > { %v881_v14 = vsub.f32 %v870_v4, %v880_v2 }
 0x5f3   : > { %v882_v15 = vmul.f32 %v881_v14, %v881_v14 }
 0x5f5   : > { %883 = vadd.xlane.f32.xlu0 %v882_v15 }
 0x668   : > { %v884_v16 = vpop.xlane.xlu0 %883 }
 0x669   : > { %v885_v17 = vmul.f32 %v884_v16, %v879_v12 }
 0x66b   : > { %v886_v18 = vadd.f32 1e-05, %v885_v17 }
 0x66d   : > { %1174 = vrsqrt.f32 %v886_v18  ;;  %vm893_vm10 = vweird.f32 %v886_v18 }
 0x673   : > { %v1175_v19 = vpop.eup %1174 }
 0x674   : > { %v888_v20 = vmul.f32 %v1175_v19, %v886_v18  ;;  %vm894_vm9 = vweird.f32 %v1175_v19 }
 0x675   : > { %vm895_vm11 = vmor %vm893_vm10, %vm894_vm9 }
 0x676   : > { %v889_v21 = vmul.f32 %v1175_v19, %v888_v20 }
 0x678   : > { %v890_v22 = vmul.f32 0.5, %v889_v21 }
 0x67a   : > { %v891_v23 = vsub.f32 1.5, %v890_v22 }
 0x67c   : > { %v892_v24 = vmul.f32 %v1175_v19, %v891_v23 }
 0x67e   : > { %v896_v27 = vsel %vm895_vm11, %v1175_v19, %v892_v24 }
 0x67f   : > { %v897_v29 = vmul.f32 %v896_v27, %v881_v14 }
 0x681   : > { %v902_v30 = vmul.f32 %v1154_v26, %v897_v29 }
 0x683   : > { %v907_v31 = vadd.f32 %v1155_v28, %v902_v30 }
 0x685   : > { %v908_v32 = vpack.c.bf16 %v907_v31, %v907_v31 }
 0x687   : > { %909 = vst [vmem:[%s282_s17] sm:$0xf] %v908_v32 }
 0x688 PF: > { %s26_s9 = sadd.s32 1, %s1196_s9  }
 0x689   : > { %p23_p4 = scmp.ge.s32.totalorder %s26_s9, 4  }
 0x68b   :  { %25 = sbr.rel (!%p23_p4) target bundleno = 7 (0x7), region = 78 }

// kernel: bert_forward.15
= control target key start
LH: loop header
LB: loop body
LE: loop exit
PB: predicated region body
PF: predicated region fallthrough
CT: control target
= control target key end

     0   :  { %v207_v14 = vmov 128.0   ;;  %s277_s1 = inlined_call_operand.vmem [shape: bf16[128,128], index: 1, kind: input, shape index: {}]   ;;  %s278_s2 = inlined_call_operand.vmem [shape: f32[1,128], index: 2, kind: input, shape index: {}]   ;;  %s279_s0 = inlined_call_operand.vmem [shape: bf16[8,128], index: 0, kind: input, shape index: {}]   ;;  %s280_s3 = inlined_call_operand.vmem [shape: f32[1,128], index: 3, kind: input, shape index: {}]   ;;  %s281_s4 = inlined_call_operand.vmem [shape: f32[1,128], index: 4, kind: input, shape index: {}]   ;;  %s282_s5 = inlined_call_operand.vmem [shape: bf16[8,128], index: 5, kind: output, shape index: {}]  }
   0x1   :  { %v198_v0 = vld [vmem:[%s277_s1 + $0x38] sm:$0xff]  ;;  %v197_v1 = vld [vmem:[%s277_s1 + $0x30] sm:$0xff]  ;;  %v196_v2 = vld [vmem:[%s277_s1 + $0x28] sm:$0xff]  ;;  %203 = vrcp.f32 %v207_v14 }
   0x2   :  { %91 = vmatpush.bf16.msra.mxu0 %v198_v0  ;;  %v195_v3 = vld [vmem:[%s277_s1 + $0x20] sm:$0xff]  ;;  %v194_v4 = vld [vmem:[%s277_s1 + $0x18] sm:$0xff]  ;;  %v193_v5 = vld [vmem:[%s277_s1 + $0x10] sm:$0xff] }
   0x3   :  { %v192_v6 = vld [vmem:[%s277_s1 + $0x8] sm:$0xff]  ;;  %v191_v7 = vld [vmem:[%s277_s1] sm:$0xff] }
   0x4   :  { %v26_v8 = vld [vmem:[%s279_s0] sm:$0xf] }
   0x5   :  { %v200_v9 = vld [vmem:[%s278_s2] ss:$0 sm:$0xff] }
   0x6   :  { %92 = vmatpush.bf16.msra.mxu0 %v197_v1  ;;  %v201_v34 = vld [vmem:[%s280_s3] ss:$0 sm:$0xff] }
   0x7   :  { %v204_v15 = vpop.eup %203  ;;  %v202_v36 = vld [vmem:[%s281_s4] ss:$0 sm:$0xff] }
   0x8   :  { %v119_v16 = vmul.f32 128.0, %v204_v15  ;;  %vm123_vm0 = vweird.f32 %v204_v15 }
   0xa   :  { %93 = vmatpush.bf16.msra.mxu0 %v196_v2  ;;  %v120_v17 = vsub.f32 1.0, %v119_v16 }
   0xc   :  { %v121_v18 = vmul.f32 %v204_v15, %v120_v17 }
   0xe   :  { %94 = vmatpush.bf16.msra.mxu0 %v195_v3  ;;  %v122_v19 = vadd.f32 %v204_v15, %v121_v18 }
  0x10   :  { %v124_v20 = vsel %vm123_vm0, %v204_v15, %v122_v19 }
  0x12   :  { %95 = vmatpush.bf16.msra.mxu0 %v194_v4 }
  0x16   :  { %96 = vmatpush.bf16.msra.mxu0 %v193_v5 }
  0x1a   :  { %97 = vmatpush.bf16.msra.mxu0 %v192_v6 }
  0x1e   :  { %98 = vmatpush.bf16.msra.mxu0 %v191_v7 }
  0x21   :  { %99 = vmatmul.bf16.vlgmr.msra.gmra.mxu0 %v26_v8 }
  0x9e   :  { %v100_v10 = vpop.f32.mrf.mxu0 }
  0x9f   :  { %v114_v11 = vadd.f32 %v200_v9, %v100_v10 }
  0xa1   :  { %v115_v12 = vmax.f32 %v114_v11, 0.0 }
  0xa3   :  { %116 = vadd.xlane.f32.xlu0 %v115_v12 }
  0xa6   :  { %v102_v13 = vpop.f32.mrf.mxu0 }
 0x116   :  { %v117_v21 = vpop.xlane.xlu0 %116 }
 0x117   :  { %v125_v22 = vmul.f32 %v124_v20, %v117_v21 }
 0x119   :  { %v126_v23 = vsub.f32 %v115_v12, %v125_v22 }
 0x11b   :  { %v127_v24 = vmul.f32 %v126_v23, %v126_v23 }
 0x11d   :  { %128 = vadd.xlane.f32.xlu0 %v127_v24 }
 0x190   :  { %v129_v25 = vpop.xlane.xlu0 %128 }
 0x191   :  { %v130_v26 = vmul.f32 %v129_v25, %v124_v20 }
 0x193   :  { %v131_v27 = vadd.f32 1e-05, %v130_v26 }
 0x195   :  { %205 = vrsqrt.f32 %v131_v27  ;;  %vm138_vm2 = vweird.f32 %v131_v27 }
 0x19b   :  { %v206_v28 = vpop.eup %205 }
 0x19c   :  { %v133_v29 = vmul.f32 %v206_v28, %v131_v27  ;;  %vm139_vm1 = vweird.f32 %v206_v28 }
 0x19d   :  { %vm140_vm3 = vmor %vm138_vm2, %vm139_vm1 }
 0x19e   :  { %v134_v30 = vmul.f32 %v206_v28, %v133_v29 }
 0x1a0   :  { %v135_v31 = vmul.f32 0.5, %v134_v30 }
 0x1a2   :  { %v136_v32 = vsub.f32 1.5, %v135_v31 }
 0x1a4   :  { %v137_v33 = vmul.f32 %v206_v28, %v136_v32 }
 0x1a6   :  { %v141_v35 = vsel %vm140_vm3, %v206_v28, %v137_v33 }
 0x1a7   :  { %v142_v37 = vmul.f32 %v141_v35, %v126_v23 }
 0x1a9   :  { %v147_v38 = vmul.f32 %v201_v34, %v142_v37 }
 0x1ab   :  { %v152_v39 = vadd.f32 %v202_v36, %v147_v38 }
 0x1ad   :  { %v153_v40 = vpack.c.bf16 %v152_v39, %v152_v39 }
 0x1af   :  { %154 = vst [vmem:[%s282_s5] sm:$0xf] %v153_v40 }

// kernel: bert_forward.16
= control target key start
LH: loop header
LB: loop body
LE: loop exit
PB: predicated region body
PF: predicated region fallthrough
CT: control target
= control target key end

     0   :  { %s208_s1 = inlined_call_operand.vmem [shape: bf16[128,128], index: 1, kind: input, shape index: {}]   ;;  %s209_s2 = inlined_call_operand.vmem [shape: f32[1,128], index: 2, kind: input, shape index: {}]   ;;  %s210_s0 = inlined_call_operand.vmem [shape: bf16[8,128], index: 0, kind: input, shape index: {}]   ;;  %s211_s3 = inlined_call_operand.vmem [shape: f32[8,128], index: 3, kind: output, shape index: {}]  }
   0x1   :  { %v153_v0 = vld [vmem:[%s208_s1 + $0x38] sm:$0xff]  ;;  %v152_v1 = vld [vmem:[%s208_s1 + $0x30] sm:$0xff]  ;;  %v151_v2 = vld [vmem:[%s208_s1 + $0x28] sm:$0xff] }
   0x2   :  { %85 = vmatpush.bf16.msra.mxu0 %v153_v0  ;;  %v150_v3 = vld [vmem:[%s208_s1 + $0x20] sm:$0xff]  ;;  %v149_v4 = vld [vmem:[%s208_s1 + $0x18] sm:$0xff]  ;;  %v148_v5 = vld [vmem:[%s208_s1 + $0x10] sm:$0xff] }
   0x3   :  { %v147_v6 = vld [vmem:[%s208_s1 + $0x8] sm:$0xff]  ;;  %v146_v7 = vld [vmem:[%s208_s1] sm:$0xff] }
   0x4   :  { %v20_v8 = vld [vmem:[%s210_s0] sm:$0xf] }
   0x5   :  { %v154_v9 = vld [vmem:[%s209_s2] ss:$0 sm:$0xff] }
   0x6   :  { %86 = vmatpush.bf16.msra.mxu0 %v152_v1 }
   0xa   :  { %87 = vmatpush.bf16.msra.mxu0 %v151_v2 }
   0xe   :  { %88 = vmatpush.bf16.msra.mxu0 %v150_v3 }
  0x12   :  { %89 = vmatpush.bf16.msra.mxu0 %v149_v4 }
  0x16   :  { %90 = vmatpush.bf16.msra.mxu0 %v148_v5 }
  0x1a   :  { %91 = vmatpush.bf16.msra.mxu0 %v147_v6 }
  0x1e   :  { %92 = vmatpush.bf16.msra.mxu0 %v146_v7 }
  0x21   :  { %93 = vmatmul.bf16.vlgmr.msra.gmra.mxu0 %v20_v8 }
  0x9e   :  { %v94_v10 = vpop.f32.mrf.mxu0 }
  0x9f   :  { %v108_v11 = vadd.f32 %v154_v9, %v94_v10 }
  0xa1   :  { %109 = vst [vmem:[%s211_s3] sm:$0xff] %v108_v11 }
  0xa6   :  { %v96_v12 = vpop.f32.mrf.mxu0 }

// kernel: bert_forward.17
= control target key start
LH: loop header
LB: loop body
LE: loop exit
PB: predicated region body
PF: predicated region fallthrough
CT: control target
= control target key end

     0   :  { %s211_s1 = inlined_call_operand.vmem [shape: bf16[128,128], index: 1, kind: input, shape index: {}]   ;;  %s212_s2 = inlined_call_operand.vmem [shape: f32[1,128], index: 2, kind: input, shape index: {}]   ;;  %s213_s0 = inlined_call_operand.vmem [shape: bf16[8,128], index: 0, kind: input, shape index: {}]   ;;  %s214_s3 = inlined_call_operand.vmem [shape: f32[8,128], index: 3, kind: output, shape index: {}]  }
   0x1   :  { %v154_v0 = vld [vmem:[%s211_s1 + $0x38] sm:$0xff]  ;;  %v153_v1 = vld [vmem:[%s211_s1 + $0x30] sm:$0xff]  ;;  %v152_v2 = vld [vmem:[%s211_s1 + $0x28] sm:$0xff] }
   0x2   :  { %85 = vmatpush.bf16.msra.mxu0 %v154_v0  ;;  %v151_v3 = vld [vmem:[%s211_s1 + $0x20] sm:$0xff]  ;;  %v150_v4 = vld [vmem:[%s211_s1 + $0x18] sm:$0xff]  ;;  %v149_v5 = vld [vmem:[%s211_s1 + $0x10] sm:$0xff] }
   0x3   :  { %v148_v6 = vld [vmem:[%s211_s1 + $0x8] sm:$0xff]  ;;  %v147_v7 = vld [vmem:[%s211_s1] sm:$0xff] }
   0x4   :  { %v20_v8 = vld [vmem:[%s213_s0] sm:$0xf] }
   0x5   :  { %v155_v9 = vld [vmem:[%s212_s2] ss:$0 sm:$0xff] }
   0x6   :  { %86 = vmatpush.bf16.msra.mxu0 %v153_v1 }
   0xa   :  { %87 = vmatpush.bf16.msra.mxu0 %v152_v2 }
   0xe   :  { %88 = vmatpush.bf16.msra.mxu0 %v151_v3 }
  0x12   :  { %89 = vmatpush.bf16.msra.mxu0 %v150_v4 }
  0x16   :  { %90 = vmatpush.bf16.msra.mxu0 %v149_v5 }
  0x1a   :  { %91 = vmatpush.bf16.msra.mxu0 %v148_v6 }
  0x1e   :  { %92 = vmatpush.bf16.msra.mxu0 %v147_v7 }
  0x21   :  { %93 = vmatmul.bf16.vlgmr.msra.gmra.mxu0 %v20_v8 }
  0x9e   :  { %v94_v10 = vpop.f32.mrf.mxu0 }
  0x9f   :  { %v108_v11 = vadd.f32 %v155_v9, %v94_v10 }
  0xa1   :  { %156 = vtanh.f32 %v108_v11 }
  0xa6   :  { %v96_v12 = vpop.f32.mrf.mxu0 }
  0xa7   :  { %v157_v13 = vpop.eup %156 }
  0xa8   :  { %110 = vst [vmem:[%s214_s3] sm:$0xff] %v157_v13 }

</bundles_post_ra>
